<compile_context>
chip_gen: v5e
topology: v5e:2x2
jax: 0.10.0
libtpu: 0.0.40
codegen_flags: <defaults>
</compile_context>

<pallas_src>
import functools

import jax
import jax.numpy as jnp
from jax.experimental import pallas as pl
from jax.experimental.pallas import tpu as pltpu

LANE = 128  # classifier output padded to one full lane width


def _round_up(x, m):
    return (x + m - 1) // m * m


def _chip_kind():
    try:
        return jax.devices()[0].device_kind.lower()
    except Exception:
        return ""


def select_tanh_dtype():
    # v6e/v7x: bf16 EUP path roughly halves transcendental time and the result
    # is immediately cast to bf16 for the next matmul, so precision cost is nil.
    # v5e: no bf16 EUP; f32 tanh is already hidden under the slower MXU.
    return jnp.float32 if "v5" in _chip_kind() else jnp.bfloat16


def _select_tm_max():
    # v5e scoped-VMEM default is 16 MiB -> cap the batch tile at 512 there.
    return 512 if "v5" in _chip_kind() else 1024


def _choose_tile(batch, tm_max):
    """Pick the batch tile, avoiding pathological last-tile padding."""
    if batch <= tm_max:
        return _round_up(batch, 8)
    best_tm, best_bp = None, None
    for tm in (1024, 512, 256, 128):
        if tm > tm_max:
            continue
        bp = _round_up(batch, tm)
        if best_bp is None or bp < best_bp:   # ties keep the larger tile
            best_tm, best_bp = tm, bp
    return best_tm


def binary_net_kernel(x_ref,
                      w1_ref, b1_ref,
                      w2_ref, b2_ref,
                      w3_ref, b3_ref,
                      w4_ref, b4_ref,
                      w5_ref, b5_ref,
                      out_ref, *, tanh_dtype):
    """Fused 5-layer MLP forward for one batch tile.

    Matmul operands are bf16 (MXU-native), accumulation is f32, bias-add in
    f32, tanh in `tanh_dtype` (bf16 on v6e/v7x, f32 on v5e), activations cast
    back to bf16 as the next matmul's input.
    """
    h = x_ref[...]
    if h.dtype != jnp.bfloat16:
        h = h.astype(jnp.bfloat16)

    def hidden(h, w_ref, b_ref):
        acc = (jnp.dot(h, w_ref[...], preferred_element_type=jnp.float32)
               + b_ref[...])
        return jnp.tanh(acc.astype(tanh_dtype)).astype(jnp.bfloat16)

    h = hidden(h, w1_ref, b1_ref)
    h = hidden(h, w2_ref, b2_ref)
    h = hidden(h, w3_ref, b3_ref)
    h = hidden(h, w4_ref, b4_ref)

    logits = (jnp.dot(h, w5_ref[...], preferred_element_type=jnp.float32)
              + b5_ref[...])
    out_ref[...] = logits.astype(out_ref.dtype)


def init_params(num_features, key):
    """f32 master params matching BinaryNet layer shapes (W stored as (in, out))."""
    dims = [(num_features, 1024), (1024, 512), (512, 256), (256, 128), (128, 2)]
    params = []
    for (d_in, d_out) in dims:
        key, kw, kb = jax.random.split(key, 3)
        bound = 1.0 / jnp.sqrt(d_in)  # PyTorch nn.Linear default init range
        w = jax.random.uniform(kw, (d_in, d_out), jnp.float32, -bound, bound)
        b = jax.random.uniform(kb, (1, d_out), jnp.float32, -bound, bound)
        params.append((w, b))
    return params


def prepare_params(params):
    """Cast weights to bf16 (HBM storage dtype), keep biases f32, and zero-pad
    the classifier layer out to LANE columns so the kernel output is lane-dense."""
    flat = []
    n = len(params)
    for i, (w, b) in enumerate(params):
        if i == n - 1:
            pad = LANE - w.shape[1]
            w = jnp.pad(w, ((0, 0), (0, pad)))
            b = jnp.pad(b, ((0, 0), (0, pad)))
        flat.append(w.astype(jnp.bfloat16))
        flat.append(b.astype(jnp.float32))
    return flat


def binary_net_forward(x, flat_params, num_classes=2, tanh_dtype=None):
    """x: (B, num_features) f32 or bf16.  flat_params: [w1,b1,...,w5,b5]."""
    if tanh_dtype is None:
        tanh_dtype = select_tanh_dtype()

    B, F = x.shape
    TM = _choose_tile(B, _select_tm_max())
    Bp = _round_up(B, TM)
    if Bp != B:
        x = jnp.pad(x, ((0, Bp - B), (0, 0)))
    grid = (Bp // TM,)

    ws = flat_params[0::2]
    bs = flat_params[1::2]

    # x / out tiles follow the batch grid; weight + bias blocks have a constant
    # index_map so they are DMA'd once and stay VMEM-resident, single-buffered.
    in_specs = [pl.BlockSpec((TM, F), lambda i: (i, 0))]
    for w, b in zip(ws, bs):
        in_specs.append(pl.BlockSpec(w.shape, lambda i: (0, 0),
                                     pipeline_mode=pl.Buffered(1)))
        in_specs.append(pl.BlockSpec(b.shape, lambda i: (0, 0),
                                     pipeline_mode=pl.Buffered(1)))
    out_spec = pl.BlockSpec((TM, LANE), lambda i: (i, 0))

    # v7x: shard the batch grid across both TensorCores (only changes codegen
    # with core_parallel); elsewhere plain "parallel" is fine.
    if "v7" in _chip_kind() and grid[0] >= 2:
        dim_sem = (pltpu.CORE_PARALLEL,)
    else:
        dim_sem = ("parallel",)

    # Advisory cost estimate for XLA's scheduler.
    flops = sum(2 * Bp * w.shape[0] * w.shape[1] for w in ws)
    transcendentals = Bp * sum(w.shape[1] for w in ws[:-1])
    bytes_accessed = (sum(int(p.size) * p.dtype.itemsize for p in flat_params)
                      + int(x.size) * x.dtype.itemsize + Bp * LANE * 4)

    kernel = functools.partial(binary_net_kernel, tanh_dtype=tanh_dtype)

    out = pl.pallas_call(
        kernel,
        out_shape=jax.ShapeDtypeStruct((Bp, LANE), jnp.float32),
        grid_spec=pltpu.PrefetchScalarGridSpec(
            num_scalar_prefetch=0,
            grid=grid,
            in_specs=in_specs,
            out_specs=out_spec,
        ),
        compiler_params=pltpu.CompilerParams(
            dimension_semantics=dim_sem,
        ),
        cost_estimate=pl.CostEstimate(
            flops=flops,
            transcendentals=transcendentals,
            bytes_accessed=bytes_accessed,
        ),
    )(x, *flat_params)

    return out[:B, :num_classes]


def reference_forward(x, params, tanh_dtype=jnp.float32):
    """Same math as the kernel (bf16 matmul operands, f32 accumulate/bias,
    tanh in `tanh_dtype`, bf16 inter-layer activations)."""
    h = x.astype(jnp.bfloat16)
    n = len(params)
    out = None
    for i, (w, b) in enumerate(params):
        acc = (jnp.dot(h, w.astype(jnp.bfloat16),
                       preferred_element_type=jnp.float32)
               + b.astype(jnp.float32))
        if i < n - 1:
            h = jnp.tanh(acc.astype(tanh_dtype)).astype(jnp.bfloat16)
        else:
            out = acc
    return out


if __name__ == "__main__":
    key = jax.random.PRNGKey(0)
    key, kx = jax.random.split(key)

    batch = 8
    num_features = 32
    x = jax.random.normal(kx, (batch, num_features), jnp.float32)

    params = init_params(num_features, key)
    flat_params = prepare_params(params)

    tanh_dtype = select_tanh_dtype()
    out = binary_net_forward(x, flat_params, tanh_dtype=tanh_dtype)
    out = jax.block_until_ready(out)

    ref = reference_forward(x, params, tanh_dtype=tanh_dtype)
    assert out.shape == (batch, 2), out.shape
    assert jnp.allclose(out, ref, atol=2e-2, rtol=2e-2), "mismatch vs reference"

    print("KERNEL_OK")
</pallas_src>

<mosaic_0001>
module attributes {stable_mosaic.version = 11 : i64} {
  func.func @binary_net_kernel(%arg0: i32, %arg1: memref<8x32xf32, #tpu.memory_space<vmem>>, %arg2: memref<32x1024xbf16, #tpu.memory_space<vmem>>, %arg3: memref<1x1024xf32, #tpu.memory_space<vmem>>, %arg4: memref<1024x512xbf16, #tpu.memory_space<vmem>>, %arg5: memref<1x512xf32, #tpu.memory_space<vmem>>, %arg6: memref<512x256xbf16, #tpu.memory_space<vmem>>, %arg7: memref<1x256xf32, #tpu.memory_space<vmem>>, %arg8: memref<256x128xbf16, #tpu.memory_space<vmem>>, %arg9: memref<1x128xf32, #tpu.memory_space<vmem>>, %arg10: memref<128x128xbf16, #tpu.memory_space<vmem>>, %arg11: memref<1x128xf32, #tpu.memory_space<vmem>>, %arg12: memref<8x128xf32, #tpu.memory_space<vmem>>) attributes {dimension_semantics = [#tpu.dimension_semantics<parallel>], iteration_bounds = array<i64: 1>, scalar_prefetch = 0 : i64, scratch_operands = 0 : i64, tpu.core_type = #tpu.core_type<tc>, window_params = [{transform_indices = @transform_0, window_bounds = array<i64: 8, 32>}, {pipeline_mode = #tpu.pipeline_mode<synchronous>, transform_indices = @transform_1, window_bounds = array<i64: 32, 1024>}, {pipeline_mode = #tpu.pipeline_mode<synchronous>, transform_indices = @transform_2, window_bounds = array<i64: 1, 1024>}, {pipeline_mode = #tpu.pipeline_mode<synchronous>, transform_indices = @transform_3, window_bounds = array<i64: 1024, 512>}, {pipeline_mode = #tpu.pipeline_mode<synchronous>, transform_indices = @transform_4, window_bounds = array<i64: 1, 512>}, {pipeline_mode = #tpu.pipeline_mode<synchronous>, transform_indices = @transform_5, window_bounds = array<i64: 512, 256>}, {pipeline_mode = #tpu.pipeline_mode<synchronous>, transform_indices = @transform_6, window_bounds = array<i64: 1, 256>}, {pipeline_mode = #tpu.pipeline_mode<synchronous>, transform_indices = @transform_7, window_bounds = array<i64: 256, 128>}, {pipeline_mode = #tpu.pipeline_mode<synchronous>, transform_indices = @transform_8, window_bounds = array<i64: 1, 128>}, {pipeline_mode = #tpu.pipeline_mode<synchronous>, transform_indices = @transform_9, window_bounds = array<i64: 128, 128>}, {pipeline_mode = #tpu.pipeline_mode<synchronous>, transform_indices = @transform_10, window_bounds = array<i64: 1, 128>}, {transform_indices = @transform_11, window_bounds = array<i64: 8, 128>}]} {
    %c0 = arith.constant 0 : index
    %c0_0 = arith.constant 0 : index
    %0 = vector.load %arg1[%c0, %c0_0] : memref<8x32xf32, #tpu.memory_space<vmem>>, vector<8x32xf32>
    %1 = arith.truncf %0 : vector<8x32xf32> to vector<8x32xbf16>
    %c0_1 = arith.constant 0 : index
    %c0_2 = arith.constant 0 : index
    %2 = vector.load %arg2[%c0_1, %c0_2] : memref<32x1024xbf16, #tpu.memory_space<vmem>>, vector<32x1024xbf16>
    %cst = arith.constant dense<0.000000e+00> : vector<8x1024xf32>
    %3 = tpu.matmul %1, %2, %cst {dimension_numbers = #tpu.dot_dimension_numbers<[1], [0], [0], [1], [0, 0, 1, 1], [], []>} : vector<8x32xbf16>, vector<32x1024xbf16>, vector<8x1024xf32> -> vector<8x1024xf32>
    %c0_3 = arith.constant 0 : index
    %c0_4 = arith.constant 0 : index
    %4 = vector.load %arg3[%c0_3, %c0_4] : memref<1x1024xf32, #tpu.memory_space<vmem>>, vector<1x1024xf32>
    %5 = vector.broadcast %4 : vector<1x1024xf32> to vector<8x1024xf32>
    %6 = arith.addf %3, %5 : vector<8x1024xf32>
    %7 = arith.truncf %6 : vector<8x1024xf32> to vector<8x1024xbf16>
    %8 = math.tanh %7 : vector<8x1024xbf16>
    %c0_5 = arith.constant 0 : index
    %c0_6 = arith.constant 0 : index
    %9 = vector.load %arg4[%c0_5, %c0_6] : memref<1024x512xbf16, #tpu.memory_space<vmem>>, vector<1024x512xbf16>
    %cst_7 = arith.constant dense<0.000000e+00> : vector<8x512xf32>
    %10 = tpu.matmul %8, %9, %cst_7 {dimension_numbers = #tpu.dot_dimension_numbers<[1], [0], [0], [1], [0, 0, 1, 1], [], []>} : vector<8x1024xbf16>, vector<1024x512xbf16>, vector<8x512xf32> -> vector<8x512xf32>
    %c0_8 = arith.constant 0 : index
    %c0_9 = arith.constant 0 : index
    %11 = vector.load %arg5[%c0_8, %c0_9] : memref<1x512xf32, #tpu.memory_space<vmem>>, vector<1x512xf32>
    %12 = vector.broadcast %11 : vector<1x512xf32> to vector<8x512xf32>
    %13 = arith.addf %10, %12 : vector<8x512xf32>
    %14 = arith.truncf %13 : vector<8x512xf32> to vector<8x512xbf16>
    %15 = math.tanh %14 : vector<8x512xbf16>
    %c0_10 = arith.constant 0 : index
    %c0_11 = arith.constant 0 : index
    %16 = vector.load %arg6[%c0_10, %c0_11] : memref<512x256xbf16, #tpu.memory_space<vmem>>, vector<512x256xbf16>
    %cst_12 = arith.constant dense<0.000000e+00> : vector<8x256xf32>
    %17 = tpu.matmul %15, %16, %cst_12 {dimension_numbers = #tpu.dot_dimension_numbers<[1], [0], [0], [1], [0, 0, 1, 1], [], []>} : vector<8x512xbf16>, vector<512x256xbf16>, vector<8x256xf32> -> vector<8x256xf32>
    %c0_13 = arith.constant 0 : index
    %c0_14 = arith.constant 0 : index
    %18 = vector.load %arg7[%c0_13, %c0_14] : memref<1x256xf32, #tpu.memory_space<vmem>>, vector<1x256xf32>
    %19 = vector.broadcast %18 : vector<1x256xf32> to vector<8x256xf32>
    %20 = arith.addf %17, %19 : vector<8x256xf32>
    %21 = arith.truncf %20 : vector<8x256xf32> to vector<8x256xbf16>
    %22 = math.tanh %21 : vector<8x256xbf16>
    %c0_15 = arith.constant 0 : index
    %c0_16 = arith.constant 0 : index
    %23 = vector.load %arg8[%c0_15, %c0_16] : memref<256x128xbf16, #tpu.memory_space<vmem>>, vector<256x128xbf16>
    %cst_17 = arith.constant dense<0.000000e+00> : vector<8x128xf32>
    %24 = tpu.matmul %22, %23, %cst_17 {dimension_numbers = #tpu.dot_dimension_numbers<[1], [0], [0], [1], [0, 0, 1, 1], [], []>} : vector<8x256xbf16>, vector<256x128xbf16>, vector<8x128xf32> -> vector<8x128xf32>
    %c0_18 = arith.constant 0 : index
    %c0_19 = arith.constant 0 : index
    %25 = vector.load %arg9[%c0_18, %c0_19] : memref<1x128xf32, #tpu.memory_space<vmem>>, vector<1x128xf32>
    %26 = vector.broadcast %25 : vector<1x128xf32> to vector<8x128xf32>
    %27 = arith.addf %24, %26 : vector<8x128xf32>
    %28 = arith.truncf %27 : vector<8x128xf32> to vector<8x128xbf16>
    %29 = math.tanh %28 : vector<8x128xbf16>
    %c0_20 = arith.constant 0 : index
    %c0_21 = arith.constant 0 : index
    %30 = vector.load %arg10[%c0_20, %c0_21] : memref<128x128xbf16, #tpu.memory_space<vmem>>, vector<128x128xbf16>
    %cst_22 = arith.constant dense<0.000000e+00> : vector<8x128xf32>
    %31 = tpu.matmul %29, %30, %cst_22 {dimension_numbers = #tpu.dot_dimension_numbers<[1], [0], [0], [1], [0, 0, 1, 1], [], []>} : vector<8x128xbf16>, vector<128x128xbf16>, vector<8x128xf32> -> vector<8x128xf32>
    %c0_23 = arith.constant 0 : index
    %c0_24 = arith.constant 0 : index
    %32 = vector.load %arg11[%c0_23, %c0_24] : memref<1x128xf32, #tpu.memory_space<vmem>>, vector<1x128xf32>
    %33 = vector.broadcast %32 : vector<1x128xf32> to vector<8x128xf32>
    %34 = arith.addf %31, %33 : vector<8x128xf32>
    %c0_25 = arith.constant 0 : index
    %c0_26 = arith.constant 0 : index
    %35 = vector.load %arg12[%c0_25, %c0_26] : memref<8x128xf32, #tpu.memory_space<vmem>>, vector<8x128xf32>
    tpu.vector_store %arg12[%c0_25, %c0_26], %34 {strides = array<i32>} : memref<8x128xf32, #tpu.memory_space<vmem>>, vector<8x128xf32>,
    return
  }
  func.func @transform_0(%arg0: i32) -> (i32, i32) {
    %c0_i32 = arith.constant 0 : i32
    %c0_i32_0 = arith.constant 0 : i32
    return %arg0, %c0_i32 : i32, i32
  }
  func.func @transform_1(%arg0: i32) -> (i32, i32) {
    %c0_i32 = arith.constant 0 : i32
    %c0_i32_0 = arith.constant 0 : i32
    %c0_i32_1 = arith.constant 0 : i32
    return %c0_i32, %c0_i32_0 : i32, i32
  }
  func.func @transform_2(%arg0: i32) -> (i32, i32) {
    %c0_i32 = arith.constant 0 : i32
    %c0_i32_0 = arith.constant 0 : i32
    %c0_i32_1 = arith.constant 0 : i32
    return %c0_i32, %c0_i32_0 : i32, i32
  }
  func.func @transform_3(%arg0: i32) -> (i32, i32) {
    %c0_i32 = arith.constant 0 : i32
    %c0_i32_0 = arith.constant 0 : i32
    %c0_i32_1 = arith.constant 0 : i32
    return %c0_i32, %c0_i32_0 : i32, i32
  }
  func.func @transform_4(%arg0: i32) -> (i32, i32) {
    %c0_i32 = arith.constant 0 : i32
    %c0_i32_0 = arith.constant 0 : i32
    %c0_i32_1 = arith.constant 0 : i32
    return %c0_i32, %c0_i32_0 : i32, i32
  }
  func.func @transform_5(%arg0: i32) -> (i32, i32) {
    %c0_i32 = arith.constant 0 : i32
    %c0_i32_0 = arith.constant 0 : i32
    %c0_i32_1 = arith.constant 0 : i32
    return %c0_i32, %c0_i32_0 : i32, i32
  }
  func.func @transform_6(%arg0: i32) -> (i32, i32) {
    %c0_i32 = arith.constant 0 : i32
    %c0_i32_0 = arith.constant 0 : i32
    %c0_i32_1 = arith.constant 0 : i32
    return %c0_i32, %c0_i32_0 : i32, i32
  }
  func.func @transform_7(%arg0: i32) -> (i32, i32) {
    %c0_i32 = arith.constant 0 : i32
    %c0_i32_0 = arith.constant 0 : i32
    %c0_i32_1 = arith.constant 0 : i32
    return %c0_i32, %c0_i32_0 : i32, i32
  }
  func.func @transform_8(%arg0: i32) -> (i32, i32) {
    %c0_i32 = arith.constant 0 : i32
    %c0_i32_0 = arith.constant 0 : i32
    %c0_i32_1 = arith.constant 0 : i32
    return %c0_i32, %c0_i32_0 : i32, i32
  }
  func.func @transform_9(%arg0: i32) -> (i32, i32) {
    %c0_i32 = arith.constant 0 : i32
    %c0_i32_0 = arith.constant 0 : i32
    %c0_i32_1 = arith.constant 0 : i32
    return %c0_i32, %c0_i32_0 : i32, i32
  }
  func.func @transform_10(%arg0: i32) -> (i32, i32) {
    %c0_i32 = arith.constant 0 : i32
    %c0_i32_0 = arith.constant 0 : i32
    %c0_i32_1 = arith.constant 0 : i32
    return %c0_i32, %c0_i32_0 : i32, i32
  }
  func.func @transform_11(%arg0: i32) -> (i32, i32) {
    %c0_i32 = arith.constant 0 : i32
    %c0_i32_0 = arith.constant 0 : i32
    return %arg0, %c0_i32 : i32, i32
  }
}

</mosaic_0001>

<bundles_post_ra>
// kernel: tpu_custom_call.1
= control target key start
LH: loop header
LB: loop body
LE: loop exit
PB: predicated region body
PF: predicated region fallthrough
CT: control target
= control target key end

     0   :  { %16 = vsyncpa [#allocation3], 0  ;;  %s5495_s0 = inlined_call_operand.hbm [shape: f32[8,32], index: 0, kind: input, shape index: {}]   ;;  %s5496_s1 = inlined_call_operand.hbm [shape: bf16[32,1024], index: 1, kind: input, shape index: {}]   ;;  %s5497_s2 = inlined_call_operand.hbm [shape: f32[1,1024], index: 2, kind: input, shape index: {}]   ;;  %s5498_s3 = inlined_call_operand.hbm [shape: bf16[1024,512], index: 3, kind: input, shape index: {}]   ;;  %s5499_s4 = inlined_call_operand.hbm [shape: f32[1,512], index: 4, kind: input, shape index: {}]   ;;  %s5500_s5 = inlined_call_operand.hbm [shape: bf16[512,256], index: 5, kind: input, shape index: {}]   ;;  %s5501_s6 = inlined_call_operand.vmem [shape: f32[1,256], index: 6, kind: input, shape index: {}]   ;;  %s5502_s7 = inlined_call_operand.hbm [shape: bf16[256,128], index: 7, kind: input, shape index: {}]   ;;  %s5503_s8 = inlined_call_operand.vmem [shape: f32[1,128], index: 8, kind: input, shape index: {}]   ;;  %s5504_s9 = inlined_call_operand.hbm [shape: bf16[128,128], index: 9, kind: input, shape index: {}]   ;;  %s5505_s10 = inlined_call_operand.vmem [shape: f32[1,128], index: 10, kind: input, shape index: {}]   ;;  %s5506_s11 = inlined_call_operand.hbm [shape: f32[8,128], index: 11, kind: output, shape index: {}]  }
   0x1   :  { %17 = vsyncpa [#allocation6], 0 }
   0x2   :  { %18 = vsyncpa [#allocation9], 0 }
   0x3   :  { %19 = vsyncpa [#allocation12], 0 }
   0x4   :  { %20 = vsyncpa [#allocation15], 0  ;;  %s37_s19 = sshll.u32 %s5496_s1, 4  ;;  %s38_s19 = int_to_ptr.hbm [resolvable:$true] %s37_s19 }
   0x5   :  { %21 = vsyncpa [#allocation4], 0  ;;  %s5245_s20 = smov [#allocation5]   ;;  %s61_s24 = sshll.u32 %s5498_s3, 4  ;;  %s62_s24 = int_to_ptr.hbm [resolvable:$true] %s61_s24 }
   0x6   :  { %s39_s21 = sshll.u32 %s5245_s20, 4  ;;  %s5246_s25 = smov 512   ;;  %s40_s21 = int_to_ptr.vmem [resolvable:$true] %s39_s21 }
   0x7   :  { %s5247_s26 = smov 32   ;;  %s5248_s27 = smov [#allocation8]  }
   0x8   :  { %45 = dma.hbm_to_vmem [thread:$0]  %s38_s19, 2048, %s40_s21, [#allocation6], %s5246_s25, %s5246_s25, %s5247_s26  }
   0x9   :  { %s63_s28 = sshll.u32 %s5248_s27, 4  ;;  %s5249_s29 = smov 256   ;;  %s64_s28 = int_to_ptr.vmem [resolvable:$true] %s63_s28 }
   0xa   :  { %s5250_s30 = smov 16   ;;  %s85_s13 = sshll.u32 %s5500_s5, 4  ;;  %s86_s13 = int_to_ptr.hbm [resolvable:$true] %s85_s13 }
   0xb   :  { %69 = dma.hbm_to_vmem [thread:$0]  %s62_s24, 32768, %s64_s28, [#allocation9], %s5249_s29, %s5249_s29, %s5250_s30  }
   0xc   :  { %s5251_s14 = smov [#allocation11]   ;;  %s27_s17 = sshll.u32 %s5495_s0, 4  ;;  %s28_s17 = int_to_ptr.hbm [resolvable:$true] %s27_s17 }
   0xd   :  { %s87_s15 = sshll.u32 %s5251_s14, 4  ;;  %s5252_s18 = smov 128   ;;  %s88_s15 = int_to_ptr.vmem [resolvable:$true] %s87_s15 }
   0xe   :  { %s5253_s19 = smov 8   ;;  %s5254_s20 = smov [#allocation2]  }
   0xf   :  { %93 = dma.hbm_to_vmem [thread:$0]  %s86_s13, 8192, %s88_s15, [#allocation12], %s5252_s18, %s5252_s18, %s5253_s19  }
  0x10   :  { %s29_s21 = sshll.u32 %s5254_s20, 4  ;;  %s51_s24 = sshll.u32 %s5497_s2, 4  ;;  %s30_s21 = int_to_ptr.vmem [resolvable:$true] %s29_s21  ;;  %s52_s24 = int_to_ptr.hbm [resolvable:$true] %s51_s24 }
  0x11   :  { %32 = dma.hbm_to_vmem [thread:$0]  %s28_s17, 128, %s30_s21, [#allocation3]  }
  0x12   :  { %s75_s26 = sshll.u32 %s5499_s4, 4  ;;  %s5255_s27 = smov [#allocation7]   ;;  %s76_s26 = int_to_ptr.hbm [resolvable:$true] %s75_s26 }
  0x13   :  { %s53_s28 = sshll.u32 %s5255_s27, 4  ;;  %s5256_s0 = smov [#allocation10]   ;;  %s54_s28 = int_to_ptr.vmem [resolvable:$true] %s53_s28 }
  0x14   :  { %56 = dma.hbm_to_vmem [thread:$0]  %s52_s24, 128, %s54_s28, [#allocation6]  }
  0x15   :  { %s77_s29 = sshll.u32 %s5256_s0, 4  ;;  %s100_s12 = sshll.u32 %s5502_s7, 4  ;;  %s78_s29 = int_to_ptr.vmem [resolvable:$true] %s77_s29  ;;  %s101_s12 = int_to_ptr.hbm [resolvable:$true] %s100_s12 }
  0x16   :  { %80 = dma.hbm_to_vmem [thread:$0]  %s76_s26, 64, %s78_s29, [#allocation9]  }
  0x17   :  { %s5257_s2 = smov [#allocation13]   ;;  %s115_s4 = sshll.u32 %s5504_s9, 4  ;;  %s116_s4 = int_to_ptr.hbm [resolvable:$true] %s115_s4 }
  0x18   :  { %s102_s13 = sshll.u32 %s5257_s2, 4  ;;  %s5258_s16 = smov 64   ;;  %s103_s13 = int_to_ptr.vmem [resolvable:$true] %s102_s13 }
  0x19   :  { %s5259_s3 = smov 4   ;;  %s5260_s17 = smov [#allocation14]  }
  0x1a   :  { %108 = dma.hbm_to_vmem [thread:$0]  %s101_s12, 2048, %s103_s13, [#allocation12], %s5258_s16, %s5258_s16, %s5259_s3  }
  0x1b   :  { %s117_s18 = sshll.u32 %s5260_s17, 4  ;;  %s118_s18 = int_to_ptr.vmem [resolvable:$true] %s117_s18 }
  0x1c   :  { %123 = dma.hbm_to_vmem [thread:$0]  %s116_s4, 1024, %s118_s18, [#allocation15], %s5258_s16, %s5258_s16, %s5259_s3  }
  0x1d   :  { %5233 = dma.done.wait [#allocation3], 128  }
  0x1e   :  { %5234 = vsyncadd [#allocation3], 4294967168 }
  0x1f   :  { %5235 = dma.done.wait [#allocation6], 2176  }
  0x20   :  { %5236 = vsyncadd [#allocation6], 4294965120 }
  0x21   :  { %5237 = dma.done.wait [#allocation9], 32832  }
  0x22   :  { %5238 = vsyncadd [#allocation9], 4294934464 }
  0x23   :  { %5239 = dma.done.wait [#allocation12], 10240  }
  0x24   :  { %5240 = vsyncadd [#allocation12], 4294957056 }
  0x25   :  { %5241 = dma.done.wait [#allocation15], 1024  }
  0x26   :  { %5242 = vsyncadd [#allocation15], 4294966272  ;;  %v3194_v0 = vld [vmem:[#allocation5 + $0x40] sm:$0xf]  ;;  %v4616_v2 = vld [vmem:[#allocation5 + $0x44] sm:$0xf] }
  0x27   :  { %v4620_v1 = vld [vmem:[#allocation5 + $0x5c] sm:$0xf0]  ;;  %v3196_v4 = vld [vmem:[#allocation5 + $0x60] sm:$0xf0]  ;;  %v3202_v5 = vld [vmem:[#allocation5 + $0x48] sm:$0xf] }
  0x28   :  { %v3195_v3 = vor.u32 %v4620_v1, %v3194_v0  ;;  %v4621_v6 = vld [vmem:[#allocation5 + $0x64] sm:$0xf0]  ;;  %v3199_v7 = vor.u32 %v4616_v2, %v3196_v4  ;;  %v3162_v9 = vld [vmem:[#allocation5] sm:$0xf]  ;;  %v4608_v11 = vld [vmem:[#allocation5 + $0x4] sm:$0xf] }
  0x29   :  { %v3203_v8 = vor.u32 %v4621_v6, %v3202_v5  ;;  %v4612_v10 = vld [vmem:[#allocation5 + $0x1c] sm:$0xf0]  ;;  %v3164_v13 = vld [vmem:[#allocation5 + $0x20] sm:$0xf0]  ;;  %v3170_v14 = vld [vmem:[#allocation5 + $0x8] sm:$0xf] }
  0x2a   :  { %285 = vmatpush.bf16.msra.mxu3 %v3195_v3  ;;  %v3163_v12 = vor.u32 %v4612_v10, %v3162_v9  ;;  %v4613_v15 = vld [vmem:[#allocation5 + $0x24] sm:$0xf0]  ;;  %298 = vmatpush.bf16.msra.mxu1 %v3199_v7  ;;  %v3167_v16 = vor.u32 %v4608_v11, %v3164_v13  ;;  %v159_v18 = vld [vmem:[#allocation2] sm:$0xff]  ;;  %vm275_vm0 = vcmask 261120   ;;  %v4617_v19 = vld [vmem:[#allocation5 + $0x4c] sm:$0xf] }
  0x2b   :  { %311 = vmatpush.bf16.msra.mxu2 %v3203_v8  ;;  %v3171_v17 = vor.u32 %v4613_v15, %v3170_v14  ;;  %v3204_v20 = vld [vmem:[#allocation5 + $0x68] sm:$0xf0]  ;;  %v4618_v22 = vld [vmem:[#allocation5 + $0x54] sm:$0xf]  ;;  %v3218_v24 = vld [vmem:[#allocation5 + $0x58] sm:$0xf]  ;;  %v5346_v25 = vpack.c.bf16 %v159_v18, %v159_v18 }
  0x2c   :  { %v3207_v21 = vor.u32 %v4617_v19, %v3204_v20  ;;  %v3212_v23 = vld [vmem:[#allocation5 + $0x70] sm:$0xf0]  ;;  %v4623_v27 = vld [vmem:[#allocation5 + $0x74] sm:$0xf0]  ;;  %v4609_v28 = vld [vmem:[#allocation5 + $0xc] sm:$0xf] }
  0x2d   :  { %v3215_v26 = vor.u32 %v4618_v22, %v3212_v23  ;;  %v3172_v29 = vld [vmem:[#allocation5 + $0x28] sm:$0xf0]  ;;  %v3219_v30 = vor.u32 %v4623_v27, %v3218_v24  ;;  %v4610_v31 = vld [vmem:[#allocation5 + $0x14] sm:$0xf]  ;;  %v3186_v33 = vld [vmem:[#allocation5 + $0x18] sm:$0xf] }
  0x2e   :  { %286 = vmatpush.bf16.msra.mxu3 %v3163_v12  ;;  %v3180_v32 = vld [vmem:[#allocation5 + $0x30] sm:$0xf0]  ;;  %299 = vmatpush.bf16.msra.mxu1 %v3167_v16  ;;  %v4615_v34 = vld [vmem:[#allocation5 + $0x34] sm:$0xf0]  ;;  %v3210_v35 = vld [vmem:[#allocation5 + $0x50] sm:$0xf]  ;;  %v3175_v37 = vor.u32 %v4609_v28, %v3172_v29 }
  0x2f   :  { %312 = vmatpush.bf16.msra.mxu2 %v3171_v17  ;;  %v4622_v36 = vld [vmem:[#allocation5 + $0x6c] sm:$0xf0]  ;;  %v3183_v38 = vor.u32 %v4610_v31, %v3180_v32  ;;  %v4619_v42 = vld [vmem:[#allocation5 + $0x5c] sm:$0xf]  ;;  %v3187_v43 = vor.u32 %v4615_v34, %v3186_v33  ;;  %v3474_v48 = vld [vmem:[#allocation8 + $0x1e0] sm:$0xf] }
  0x30   :  { %v3211_v39 = vor.u32 %v4622_v36, %v3210_v35  ;;  %v3178_v40 = vld [vmem:[#allocation5 + $0x10] sm:$0xf]  ;;  %v3220_v44 = vld [vmem:[#allocation5 + $0x78] sm:$0xf0]  ;;  %v4686_v49 = vld [vmem:[#allocation8 + $0x1ec] sm:$0xf0] }
  0x31   :  { %v4614_v41 = vld [vmem:[#allocation5 + $0x2c] sm:$0xf0]  ;;  %3224 = vmatmul.msk.bf16.vlgmr.msra.gmra.mxu3 %vm275_vm0, %v5346_v25  ;;  %v4611_v45 = vld [vmem:[#allocation5 + $0x1c] sm:$0xf]  ;;  %3225 = vmatmul.msk.bf16.vlgmr.msra.gmra.mxu1 %vm275_vm0, %v5346_v25  ;;  %v3223_v47 = vor.u32 %v4619_v42, %v3220_v44  ;;  %v3458_v50 = vld [vmem:[#allocation8 + $0x1c0] sm:$0xf]  ;;  %v3475_v52 = vor.u32 %v4686_v49, %v3474_v48 }
  0x32   :  { %324 = vmatpush.bf16.msrb.mxu3 %v3207_v21  ;;  %350 = vmatpush.bf16.msrb.mxu1 %v3215_v26  ;;  %v3188_v46 = vld [vmem:[#allocation5 + $0x38] sm:$0xf0]  ;;  %v3179_v51 = vor.u32 %v4614_v41, %v3178_v40  ;;  %v4682_v53 = vld [vmem:[#allocation8 + $0x1cc] sm:$0xf0]  ;;  %v3346_v54 = vld [vmem:[#allocation8 + $0xe0] sm:$0xf] }
  0x33   :  { %363 = vmatpush.bf16.msrb.mxu2 %v3219_v30  ;;  %337 = vmatpush.bf16.msra.mxu0 %v3211_v39  ;;  %v4654_v55 = vld [vmem:[#allocation8 + $0xec] sm:$0xf0]  ;;  %v3602_v57 = vld [vmem:[#allocation8 + $0x2e0] sm:$0xf]  ;;  %v3191_v59 = vor.u32 %v4611_v45, %v3188_v46  ;;  %v3459_v63 = vor.u32 %v4682_v53, %v3458_v50  ;;  %s5261_s22 = smov [#allocation16]  }
  0x34   :  { %3226 = vmatmul.msk.bf16.vlgmr.msra.gmra.mxu2 %vm275_vm0, %v5346_v25  ;;  %v3347_v56 = vor.u32 %v4654_v55, %v3346_v54  ;;  %v4718_v58 = vld [vmem:[#allocation8 + $0x2ec] sm:$0xf0]  ;;  %v3330_v61 = vld [vmem:[#allocation8 + $0xc0] sm:$0xf]  ;;  %s3144_s23 = sshll.u32 %s5261_s22, 4  ;;  %s3145_s23 = int_to_ptr.vmem [resolvable:$true] %s3144_s23 }
  0x35   :  { %v3603_v60 = vor.u32 %v4718_v58, %v3602_v57  ;;  %v4650_v62 = vld [vmem:[#allocation8 + $0xcc] sm:$0xf0]  ;;  %v3586_v0 = vld [vmem:[#allocation8 + $0x2c0] sm:$0xf] }
  0x36   :  { %325 = vmatpush.bf16.msrb.mxu3 %v3175_v37  ;;  %351 = vmatpush.bf16.msrb.mxu1 %v3183_v38  ;;  %v4714_v1 = vld [vmem:[#allocation8 + $0x2cc] sm:$0xf0]  ;;  %v3442_v2 = vld [vmem:[#allocation8 + $0x1a0] sm:$0xf]  ;;  %v3331_v5 = vor.u32 %v4650_v62, %v3330_v61 }
  0x37   :  { %364 = vmatpush.bf16.msrb.mxu2 %v3187_v43  ;;  %338 = vmatpush.bf16.msra.mxu0 %v3179_v51  ;;  %v4678_v3 = vld [vmem:[#allocation8 + $0x1ac] sm:$0xf0]  ;;  %v3587_v4 = vor.u32 %v4714_v1, %v3586_v0  ;;  %v3570_v6 = vld [vmem:[#allocation8 + $0x2a0] sm:$0xf] }
  0x38   :  { %v4710_v7 = vld [vmem:[#allocation8 + $0x2ac] sm:$0xf0]  ;;  %v3314_v8 = vld [vmem:[#allocation8 + $0xa0] sm:$0xf]  ;;  %v3443_v10 = vor.u32 %v4678_v3, %v3442_v2 }
  0x39   :  { %v4646_v9 = vld [vmem:[#allocation8 + $0xac] sm:$0xf0]  ;;  %v3426_v11 = vld [vmem:[#allocation8 + $0x180] sm:$0xf]  ;;  %v3571_v13 = vor.u32 %v4710_v7, %v3570_v6 }
  0x3a   :  { %376 = vmatpush.bf16.msra.mxu3 %v3223_v47  ;;  %1974 = vmatpush.bf16.msra.mxu1 %v3475_v52  ;;  %v4674_v12 = vld [vmem:[#allocation8 + $0x18c] sm:$0xf0]  ;;  %v3315_v14 = vor.u32 %v4646_v9, %v3314_v8  ;;  %v3298_v15 = vld [vmem:[#allocation8 + $0x80] sm:$0xf] }
  0x3b   :  { %1987 = vmatpush.bf16.msra.mxu2 %v3603_v60  ;;  %1961 = vmatpush.bf16.msrb.mxu0 %v3347_v56  ;;  %v3554_v16 = vld [vmem:[#allocation8 + $0x280] sm:$0xf]  ;;  %v4706_v17 = vld [vmem:[#allocation8 + $0x28c] sm:$0xf0]  ;;  %v3427_v21 = vor.u32 %v4674_v12, %v3426_v11 }
  0x3c   :  { %3228 = vmatmul.msk.bf16.vlgmr.msra.gmra.mxu0 %vm275_vm0, %v5346_v25  ;;  %v4642_v18 = vld [vmem:[#allocation8 + $0x8c] sm:$0xf0]  ;;  %v3730_v19 = vld [vmem:[#allocation8 + $0x3e0] sm:$0xf]  ;;  %v3555_v24 = vor.u32 %v4706_v17, %v3554_v16 }
  0x3d   :  { %v4750_v20 = vld [vmem:[#allocation8 + $0x3ec] sm:$0xf0]  ;;  %v3410_v22 = vld [vmem:[#allocation8 + $0x160] sm:$0xf]  ;;  %v3299_v26 = vor.u32 %v4642_v18, %v3298_v15 }
  0x3e   :  { %377 = vmatpush.bf16.msra.mxu3 %v3191_v59  ;;  %1975 = vmatpush.bf16.msra.mxu1 %v3459_v63  ;;  %v4670_v23 = vld [vmem:[#allocation8 + $0x16c] sm:$0xf0]  ;;  %v3282_v27 = vld [vmem:[#allocation8 + $0x60] sm:$0xf]  ;;  %v3731_v30 = vor.u32 %v4750_v20, %v3730_v19 }
  0x3f   :  { %1988 = vmatpush.bf16.msra.mxu2 %v3587_v4  ;;  %1962 = vmatpush.bf16.msrb.mxu0 %v3331_v5  ;;  %v3538_v28 = vld [vmem:[#allocation8 + $0x260] sm:$0xf]  ;;  %v4702_v29 = vld [vmem:[#allocation8 + $0x26c] sm:$0xf0]  ;;  %v3411_v34 = vor.u32 %v4670_v23, %v3410_v22 }
  0x40   :  { %v4638_v31 = vld [vmem:[#allocation8 + $0x6c] sm:$0xf0]  ;;  %v3714_v32 = vld [vmem:[#allocation8 + $0x3c0] sm:$0xf]  ;;  %v3539_v37 = vor.u32 %v4702_v29, %v3538_v28 }
  0x41   :  { %3227 = vmatmul.msk.bf16.vlgmr.msrb.gmra.mxu3 %vm275_vm0, %v5346_v25  ;;  %v4746_v33 = vld [vmem:[#allocation8 + $0x3cc] sm:$0xf0]  ;;  %3229 = vmatmul.msk.bf16.vlgmr.msrb.gmra.mxu1 %vm275_vm0, %v5346_v25  ;;  %v3394_v35 = vld [vmem:[#allocation8 + $0x140] sm:$0xf]  ;;  %v3283_v38 = vor.u32 %v4638_v31, %v3282_v27 }
  0x42   :  { %1976 = vmatpush.bf16.msra.mxu1 %v3443_v10  ;;  %v4666_v36 = vld [vmem:[#allocation8 + $0x14c] sm:$0xf0]  ;;  %2000 = vmatpush.bf16.msrb.mxu3 %v3731_v30  ;;  %v3266_v39 = vld [vmem:[#allocation8 + $0x40] sm:$0xf]  ;;  %v3715_v42 = vor.u32 %v4746_v33, %v3714_v32 }
  0x43   :  { %1989 = vmatpush.bf16.msra.mxu2 %v3571_v13  ;;  %1963 = vmatpush.bf16.msrb.mxu0 %v3315_v14  ;;  %v3522_v40 = vld [vmem:[#allocation8 + $0x240] sm:$0xf]  ;;  %v4698_v41 = vld [vmem:[#allocation8 + $0x24c] sm:$0xf0]  ;;  %v3395_v46 = vor.u32 %v4666_v36, %v3394_v35 }
  0x44   :  { %3230 = vmatmul.msk.bf16.vlgmr.msrb.gmra.mxu2 %vm275_vm0, %v5346_v25  ;;  %v4634_v43 = vld [vmem:[#allocation8 + $0x4c] sm:$0xf0]  ;;  %v3698_v44 = vld [vmem:[#allocation8 + $0x3a0] sm:$0xf]  ;;  %v3523_v49 = vor.u32 %v4698_v41, %v3522_v40 }
  0x45   :  { %v4742_v45 = vld [vmem:[#allocation8 + $0x3ac] sm:$0xf0]  ;;  %v3378_v47 = vld [vmem:[#allocation8 + $0x120] sm:$0xf]  ;;  %v3267_v50 = vor.u32 %v4634_v43, %v3266_v39 }
  0x46   :  { %1977 = vmatpush.bf16.msra.mxu1 %v3427_v21  ;;  %v4662_v48 = vld [vmem:[#allocation8 + $0x12c] sm:$0xf0]  ;;  %2001 = vmatpush.bf16.msrb.mxu3 %v3715_v42  ;;  %v3250_v51 = vld [vmem:[#allocation8 + $0x20] sm:$0xf]  ;;  %v3699_v54 = vor.u32 %v4742_v45, %v3698_v44 }
  0x47   :  { %1990 = vmatpush.bf16.msra.mxu2 %v3555_v24  ;;  %1964 = vmatpush.bf16.msrb.mxu0 %v3299_v26  ;;  %v3506_v52 = vld [vmem:[#allocation8 + $0x220] sm:$0xf]  ;;  %v4694_v53 = vld [vmem:[#allocation8 + $0x22c] sm:$0xf0]  ;;  %v3379_v60 = vor.u32 %v4662_v48, %v3378_v47 }
  0x48   :  { %v4630_v55 = vld [vmem:[#allocation8 + $0x2c] sm:$0xf0]  ;;  %v3682_v56 = vld [vmem:[#allocation8 + $0x380] sm:$0xf]  ;;  %v3507_v62 = vor.u32 %v4694_v53, %v3506_v52 }
  0x49   :  { %v4738_v57 = vld [vmem:[#allocation8 + $0x38c] sm:$0xf0]  ;;  %v3362_v58 = vld [vmem:[#allocation8 + $0x100] sm:$0xf]  ;;  %v3251_v0 = vor.u32 %v4630_v55, %v3250_v51 }
  0x4a   :  { %1978 = vmatpush.bf16.msra.mxu1 %v3411_v34  ;;  %v4658_v59 = vld [vmem:[#allocation8 + $0x10c] sm:$0xf0]  ;;  %v3986_v61 = vld [vmem:[#allocation8 + $0x5e0] sm:$0xf]  ;;  %2002 = vmatpush.bf16.msrb.mxu3 %v3699_v54  ;;  %v3683_v3 = vor.u32 %v4738_v57, %v3682_v56 }
  0x4b   :  { %1991 = vmatpush.bf16.msra.mxu2 %v3539_v37  ;;  %1965 = vmatpush.bf16.msrb.mxu0 %v3283_v38  ;;  %v4814_v63 = vld [vmem:[#allocation8 + $0x5ec] sm:$0xf0]  ;;  %v3490_v1 = vld [vmem:[#allocation8 + $0x200] sm:$0xf]  ;;  %v3363_v10 = vor.u32 %v4658_v59, %v3362_v58 }
  0x4c   :  { %v4690_v2 = vld [vmem:[#allocation8 + $0x20c] sm:$0xf0]  ;;  %v3234_v4 = vld [vmem:[#allocation8] sm:$0xf]  ;;  %v3987_v14 = vor.u32 %v4814_v63, %v3986_v61 }
  0x4d   :  { %v4626_v5 = vld [vmem:[#allocation8 + $0xc] sm:$0xf0]  ;;  %v3858_v6 = vld [vmem:[#allocation8 + $0x4e0] sm:$0xf]  ;;  %v3491_v11 = vor.u32 %v4690_v2, %v3490_v1 }
  0x4e   :  { %1979 = vmatpush.bf16.msra.mxu1 %v3395_v46  ;;  %v4782_v7 = vld [vmem:[#allocation8 + $0x4ec] sm:$0xf0]  ;;  %v4114_v8 = vld [vmem:[#allocation8 + $0x6e0] sm:$0xf]  ;;  %v3235_v15 = vor.u32 %v4626_v5, %v3234_v4  ;;  %2003 = vmatpush.bf16.msrb.mxu3 %v3683_v3 }
  0x4f   :  { %1992 = vmatpush.bf16.msra.mxu2 %v3523_v49  ;;  %1966 = vmatpush.bf16.msrb.mxu0 %v3267_v50  ;;  %v4846_v9 = vld [vmem:[#allocation8 + $0x6ec] sm:$0xf0]  ;;  %v3666_v12 = vld [vmem:[#allocation8 + $0x360] sm:$0xf]  ;;  %v3859_v18 = vor.u32 %v4782_v7, %v3858_v6 }
  0x50   :  { %v4734_v13 = vld [vmem:[#allocation8 + $0x36c] sm:$0xf0]  ;;  %v3970_v16 = vld [vmem:[#allocation8 + $0x5c0] sm:$0xf]  ;;  %v4115_v19 = vor.u32 %v4846_v9, %v4114_v8 }
  0x51   :  { %3231 = vmatmul.msk.bf16.vlgmr.msra.gmra.mxu3 %vm275_vm0, %v5346_v25  ;;  %v4810_v17 = vld [vmem:[#allocation8 + $0x5cc] sm:$0xf0]  ;;  %v3842_v20 = vld [vmem:[#allocation8 + $0x4c0] sm:$0xf]  ;;  %v3667_v21 = vor.u32 %v4734_v13, %v3666_v12 }
  0x52   :  { %1980 = vmatpush.bf16.msra.mxu1 %v3379_v60  ;;  %v4778_v22 = vld [vmem:[#allocation8 + $0x4cc] sm:$0xf0]  ;;  %v4098_v23 = vld [vmem:[#allocation8 + $0x6c0] sm:$0xf]  ;;  %v3971_v26 = vor.u32 %v4810_v17, %v3970_v16 }
  0x53   :  { %1993 = vmatpush.bf16.msra.mxu2 %v3507_v62  ;;  %1967 = vmatpush.bf16.msrb.mxu0 %v3251_v0  ;;  %v4842_v24 = vld [vmem:[#allocation8 + $0x6cc] sm:$0xf0]  ;;  %v3954_v27 = vld [vmem:[#allocation8 + $0x5a0] sm:$0xf]  ;;  %v3843_v29 = vor.u32 %v4778_v22, %v3842_v20 }
  0x54   :  { %v4806_v28 = vld [vmem:[#allocation8 + $0x5ac] sm:$0xf0]  ;;  %v4099_v25 = vor.u32 %v4842_v24, %v4098_v23  ;;  %2004 = vmatpush.bf16.msrb.mxu3 %v3667_v21  ;;  %v3938_v31 = vld [vmem:[#allocation8 + $0x580] sm:$0xf] }
  0x55   :  { %v3955_v30 = vor.u32 %v4806_v28, %v3954_v27  ;;  %v4802_v32 = vld [vmem:[#allocation8 + $0x58c] sm:$0xf0]  ;;  %v3650_v34 = vld [vmem:[#allocation8 + $0x340] sm:$0xf] }
  0x56   :  { %1981 = vmatpush.bf16.msra.mxu1 %v3363_v10  ;;  %v3939_v33 = vor.u32 %v4802_v32, %v3938_v31  ;;  %v4730_v35 = vld [vmem:[#allocation8 + $0x34c] sm:$0xf0]  ;;  %v3826_v37 = vld [vmem:[#allocation8 + $0x4a0] sm:$0xf] }
  0x57   :  { %1994 = vmatpush.bf16.msra.mxu2 %v3491_v11  ;;  %1968 = vmatpush.bf16.msrb.mxu0 %v3235_v15  ;;  %v3651_v36 = vor.u32 %v4730_v35, %v3650_v34  ;;  %v4774_v38 = vld [vmem:[#allocation8 + $0x4ac] sm:$0xf0]  ;;  %v4082_v39 = vld [vmem:[#allocation8 + $0x6a0] sm:$0xf] }
  0x58   :  { %v3827_v40 = vor.u32 %v4774_v38, %v3826_v37  ;;  %v4838_v41 = vld [vmem:[#allocation8 + $0x6ac] sm:$0xf0]  ;;  %v3922_v43 = vld [vmem:[#allocation8 + $0x560] sm:$0xf] }
  0x59   :  { %2005 = vmatpush.bf16.msrb.mxu3 %v3651_v36  ;;  %v4083_v42 = vor.u32 %v4838_v41, %v4082_v39  ;;  %v4798_v44 = vld [vmem:[#allocation8 + $0x56c] sm:$0xf0]  ;;  %v3634_v46 = vld [vmem:[#allocation8 + $0x320] sm:$0xf] }
  0x5a   :  { %2026 = vmatpush.bf16.msrb.mxu1 %v3987_v14  ;;  %v3923_v45 = vor.u32 %v4798_v44, %v3922_v43  ;;  %v4726_v47 = vld [vmem:[#allocation8 + $0x32c] sm:$0xf0]  ;;  %v3810_v49 = vld [vmem:[#allocation8 + $0x480] sm:$0xf] }
  0x5b   :  { %2013 = vmatpush.bf16.msra.mxu0 %v3859_v18  ;;  %2039 = vmatpush.bf16.msrb.mxu2 %v4115_v19  ;;  %v3635_v48 = vor.u32 %v4726_v47, %v3634_v46  ;;  %v4770_v50 = vld [vmem:[#allocation8 + $0x48c] sm:$0xf0]  ;;  %v4066_v51 = vld [vmem:[#allocation8 + $0x680] sm:$0xf] }
  0x5c   :  { %v3811_v52 = vor.u32 %v4770_v50, %v3810_v49  ;;  %v4834_v53 = vld [vmem:[#allocation8 + $0x68c] sm:$0xf0]  ;;  %v3906_v55 = vld [vmem:[#allocation8 + $0x540] sm:$0xf] }
  0x5d   :  { %2006 = vmatpush.bf16.msrb.mxu3 %v3635_v48  ;;  %v4067_v54 = vor.u32 %v4834_v53, %v4066_v51  ;;  %v4794_v56 = vld [vmem:[#allocation8 + $0x54c] sm:$0xf0]  ;;  %v3618_v58 = vld [vmem:[#allocation8 + $0x300] sm:$0xf] }
  0x5e   :  { %2027 = vmatpush.bf16.msrb.mxu1 %v3971_v26  ;;  %v3907_v57 = vor.u32 %v4794_v56, %v3906_v55  ;;  %v4722_v59 = vld [vmem:[#allocation8 + $0x30c] sm:$0xf0]  ;;  %v3794_v61 = vld [vmem:[#allocation8 + $0x460] sm:$0xf] }
  0x5f   :  { %2014 = vmatpush.bf16.msra.mxu0 %v3843_v29  ;;  %2040 = vmatpush.bf16.msrb.mxu2 %v4099_v25  ;;  %v3619_v60 = vor.u32 %v4722_v59, %v3618_v58  ;;  %v4766_v62 = vld [vmem:[#allocation8 + $0x46c] sm:$0xf0]  ;;  %v4050_v63 = vld [vmem:[#allocation8 + $0x660] sm:$0xf] }
  0x60   :  { %v3795_v0 = vor.u32 %v4766_v62, %v3794_v61  ;;  %v4830_v1 = vld [vmem:[#allocation8 + $0x66c] sm:$0xf0]  ;;  %v4242_v2 = vld [vmem:[#allocation8 + $0x7e0] sm:$0xf] }
  0x61   :  { %v4878_v3 = vld [vmem:[#allocation8 + $0x7ec] sm:$0xf0]  ;;  %2007 = vmatpush.bf16.msrb.mxu3 %v3619_v60  ;;  %v4051_v4 = vor.u32 %v4830_v1, %v4050_v63  ;;  %v3890_v6 = vld [vmem:[#allocation8 + $0x520] sm:$0xf] }
  0x62   :  { %2028 = vmatpush.bf16.msrb.mxu1 %v3955_v30  ;;  %v4243_v5 = vor.u32 %v4878_v3, %v4242_v2  ;;  %v4790_v7 = vld [vmem:[#allocation8 + $0x52c] sm:$0xf0]  ;;  %v3778_v9 = vld [vmem:[#allocation8 + $0x440] sm:$0xf] }
  0x63   :  { %2015 = vmatpush.bf16.msra.mxu0 %v3827_v40  ;;  %2041 = vmatpush.bf16.msrb.mxu2 %v4083_v42  ;;  %v3891_v8 = vor.u32 %v4790_v7, %v3890_v6  ;;  %v4762_v10 = vld [vmem:[#allocation8 + $0x44c] sm:$0xf0]  ;;  %v4034_v11 = vld [vmem:[#allocation8 + $0x640] sm:$0xf]  ;;  %v5364_v42 = vld [vmem:[#allocation7] sm:$0xff] }
  0x64   :  { %v3779_v12 = vor.u32 %v4762_v10, %v3778_v9  ;;  %v4826_v13 = vld [vmem:[#allocation8 + $0x64c] sm:$0xf0]  ;;  %v4226_v14 = vld [vmem:[#allocation8 + $0x7c0] sm:$0xf]  ;;  %v180_v46 = vperm.slane %v5364_v42, 1  ;;  %v183_v3 = vperm.slane %v5364_v42, 4 }
  0x65   :  { %2052 = vmatpush.bf16.msra.mxu3 %v4243_v5  ;;  %v4874_v15 = vld [vmem:[#allocation8 + $0x7cc] sm:$0xf0]  ;;  %v4035_v16 = vor.u32 %v4826_v13, %v4034_v11  ;;  %v3874_v18 = vld [vmem:[#allocation8 + $0x500] sm:$0xf]  ;;  %v4684_v5 = vld [vmem:[#allocation8 + $0x1e4] sm:$0xf] }
  0x66   :  { %2029 = vmatpush.bf16.msrb.mxu1 %v3939_v33  ;;  %v4227_v17 = vor.u32 %v4874_v15, %v4226_v14  ;;  %v4786_v19 = vld [vmem:[#allocation8 + $0x50c] sm:$0xf0]  ;;  %v3762_v21 = vld [vmem:[#allocation8 + $0x420] sm:$0xf]  ;;  %v3476_v6 = vld [vmem:[#allocation8 + $0x1f0] sm:$0xf0] }
  0x67   :  { %2016 = vmatpush.bf16.msra.mxu0 %v3811_v52  ;;  %2042 = vmatpush.bf16.msrb.mxu2 %v4067_v54  ;;  %v3875_v20 = vor.u32 %v4786_v19, %v3874_v18  ;;  %v4758_v22 = vld [vmem:[#allocation8 + $0x42c] sm:$0xf0]  ;;  %v4018_v24 = vld [vmem:[#allocation8 + $0x620] sm:$0xf]  ;;  %v179_v52 = vperm.slane %v5364_v42, 0  ;;  %v181_v54 = vperm.slane %v5364_v42, 2  ;;  %v3479_v11 = vor.u32 %v4684_v5, %v3476_v6 }
  0x68   :  { %v3763_v23 = vor.u32 %v4758_v22, %v3762_v21  ;;  %v4822_v26 = vld [vmem:[#allocation8 + $0x62c] sm:$0xf0]  ;;  %v4210_v27 = vld [vmem:[#allocation8 + $0x7a0] sm:$0xf]  ;;  %v184_v10 = vperm.slane %v5364_v42, 5 }
  0x69   :  { %2053 = vmatpush.bf16.msra.mxu3 %v4227_v17  ;;  %v4019_v28 = vor.u32 %v4822_v26, %v4018_v24  ;;  %v4870_v29 = vld [vmem:[#allocation8 + $0x7ac] sm:$0xf0]  ;;  %v3746_v30 = vld [vmem:[#allocation8 + $0x400] sm:$0xf]  ;;  %v4680_v15 = vld [vmem:[#allocation8 + $0x1c4] sm:$0xf] }
  0x6a   :  { %2030 = vmatpush.bf16.msrb.mxu1 %v3923_v45  ;;  %v4211_v25 = vor.u32 %v4870_v29, %v4210_v27  ;;  %v4754_v31 = vld [vmem:[#allocation8 + $0x40c] sm:$0xf0]  ;;  %v4002_v32 = vld [vmem:[#allocation8 + $0x600] sm:$0xf]  ;;  %v4652_v17 = vld [vmem:[#allocation8 + $0xe4] sm:$0xf] }
  0x6b   :  { %2017 = vmatpush.bf16.msra.mxu0 %v3795_v0  ;;  %2043 = vmatpush.bf16.msrb.mxu2 %v4051_v4  ;;  %v3747_v33 = vor.u32 %v4754_v31, %v3746_v30  ;;  %v4818_v34 = vld [vmem:[#allocation8 + $0x60c] sm:$0xf0]  ;;  %v4194_v35 = vld [vmem:[#allocation8 + $0x780] sm:$0xf]  ;;  %v3348_v18 = vld [vmem:[#allocation8 + $0xf0] sm:$0xf0] }
  0x6c   :  { %v4866_v36 = vld [vmem:[#allocation8 + $0x78c] sm:$0xf0]  ;;  %v4003_v37 = vor.u32 %v4818_v34, %v4002_v32  ;;  %v4178_v39 = vld [vmem:[#allocation8 + $0x760] sm:$0xf]  ;;  %v3604_v21 = vld [vmem:[#allocation8 + $0x2f0] sm:$0xf0]  ;;  %v3351_v29 = vor.u32 %v4652_v17, %v3348_v18 }
  0x6d   :  { %2054 = vmatpush.bf16.msra.mxu3 %v4211_v25  ;;  %v4195_v38 = vor.u32 %v4866_v36, %v4194_v35  ;;  %v4862_v40 = vld [vmem:[#allocation8 + $0x76c] sm:$0xf0]  ;;  %v4162_v43 = vld [vmem:[#allocation8 + $0x740] sm:$0xf]  ;;  %v4676_v25 = vld [vmem:[#allocation8 + $0x1a4] sm:$0xf] }
  0x6e   :  { %2031 = vmatpush.bf16.msrb.mxu1 %v3907_v57  ;;  %v4179_v41 = vor.u32 %v4862_v40, %v4178_v39  ;;  %v4858_v44 = vld [vmem:[#allocation8 + $0x74c] sm:$0xf0]  ;;  %v4146_v47 = vld [vmem:[#allocation8 + $0x720] sm:$0xf]  ;;  %v3444_v30 = vld [vmem:[#allocation8 + $0x1b0] sm:$0xf0] }
  0x6f   :  { %2018 = vmatpush.bf16.msra.mxu0 %v3779_v12  ;;  %2044 = vmatpush.bf16.msrb.mxu2 %v4035_v16  ;;  %v4163_v45 = vor.u32 %v4858_v44, %v4162_v43  ;;  %v4854_v48 = vld [vmem:[#allocation8 + $0x72c] sm:$0xf0]  ;;  %v4130_v55 = vld [vmem:[#allocation8 + $0x700] sm:$0xf]  ;;  %v3460_v16 = vld [vmem:[#allocation8 + $0x1d0] sm:$0xf0] }
  0x70   :  { %v4147_v50 = vor.u32 %v4854_v48, %v4146_v47  ;;  %v4850_v56 = vld [vmem:[#allocation8 + $0x70c] sm:$0xf0]  ;;  %v3463_v24 = vor.u32 %v4680_v15, %v3460_v16  ;;  %v185_v34 = vperm.slane %v5364_v42, 6  ;;  %v4648_v36 = vld [vmem:[#allocation8 + $0xc4] sm:$0xf] }
  0x71   :  { %2055 = vmatpush.bf16.msra.mxu3 %v4195_v38  ;;  %v4131_v57 = vor.u32 %v4850_v56, %v4130_v55  ;;  %v4712_v39 = vld [vmem:[#allocation8 + $0x2c4] sm:$0xf]  ;;  %v3588_v40 = vld [vmem:[#allocation8 + $0x2d0] sm:$0xf0] }
  0x72   :  { %2032 = vmatpush.bf16.msrb.mxu1 %v3891_v8  ;;  %v4708_v56 = vld [vmem:[#allocation8 + $0x2a4] sm:$0xf]  ;;  %v3556_v6 = vld [vmem:[#allocation8 + $0x290] sm:$0xf0] }
  0x73   :  { %2019 = vmatpush.bf16.msra.mxu0 %v3763_v23  ;;  %2045 = vmatpush.bf16.msrb.mxu2 %v4019_v28  ;;  %v182_v28 = vperm.slane %v5364_v42, 3  ;;  %v4704_v5 = vld [vmem:[#allocation8 + $0x284] sm:$0xf] }
  0x74   :  { %v3559_v17 = vor.u32 %v4704_v5, %v3556_v6  ;;  %v4636_v18 = vld [vmem:[#allocation8 + $0x64] sm:$0xf]  ;;  %v3236_v5 = vld [vmem:[#allocation8 + $0x10] sm:$0xf0] }
  0x75   :  { %2056 = vmatpush.bf16.msra.mxu3 %v4179_v41 }
  0x76   :  { %2033 = vmatpush.bf16.msrb.mxu1 %v3875_v20  ;;  %v4716_v20 = vld [vmem:[#allocation8 + $0x2e4] sm:$0xf] }
  0x77   :  { %2020 = vmatpush.bf16.msra.mxu0 %v3747_v33  ;;  %2046 = vmatpush.bf16.msrb.mxu2 %v4003_v37  ;;  %v3607_v35 = vor.u32 %v4716_v20, %v3604_v21  ;;  %v3332_v37 = vld [vmem:[#allocation8 + $0xd0] sm:$0xf0]  ;;  %v4700_v20 = vld [vmem:[#allocation8 + $0x264] sm:$0xf] }
  0x78   :  { %v3335_v48 = vor.u32 %v4648_v36, %v3332_v37  ;;  %v3540_v21 = vld [vmem:[#allocation8 + $0x270] sm:$0xf0] }
  0x79   :  { %2057 = vmatpush.bf16.msra.mxu3 %v4163_v45  ;;  %v3447_v45 = vor.u32 %v4676_v25, %v3444_v30  ;;  %v3380_v25 = vld [vmem:[#allocation8 + $0x130] sm:$0xf0] }
  0x7d   :  { %2058 = vmatpush.bf16.msra.mxu3 %v4147_v50  ;;  %v3428_v50 = vld [vmem:[#allocation8 + $0x190] sm:$0xf0] }
  0x81   :  { %2059 = vmatpush.bf16.msra.mxu3 %v4131_v57  ;;  %v3572_v57 = vld [vmem:[#allocation8 + $0x2b0] sm:$0xf0] }
  0xae   :  { %v301_v49 = vpop.f32.mrf.mxu1 }
  0xaf   :  { %v302_v51 = vadd.f32 %v301_v49, %v180_v46  ;;  %v4672_v49 = vld [vmem:[#allocation8 + $0x184] sm:$0xf] }
  0xb1   :  { %v384_v53 = vpack.c.bf16 %v302_v51, %v302_v51 }
  0xb3   :  { %v392_v58 = vunpack.c.l.bf16 %v384_v53  ;;  %v4644_v53 = vld [vmem:[#allocation8 + $0xa4] sm:$0xf] }
  0xb4   :  { %v288_v59 = vpop.f32.mrf.mxu3 }
  0xb5   :  { %v289_v60 = vadd.f32 %v288_v59, %v179_v52  ;;  %4987 = vtanh.f32 %v392_v58  ;;  %v3591_v52 = vor.u32 %v4712_v39, %v3588_v40  ;;  %v3268_v39 = vld [vmem:[#allocation8 + $0x50] sm:$0xf0]  ;;  %v4696_v40 = vld [vmem:[#allocation8 + $0x244] sm:$0xf] }
  0xb6   :  { %v303_v0 = vpop.f32.mrf.mxu1 }
  0xb7   :  { %v314_v61 = vpop.f32.mrf.mxu2  ;;  %v383_v63 = vpack.c.bf16 %v289_v60, %v289_v60  ;;  %v3431_v60 = vor.u32 %v4672_v49, %v3428_v50  ;;  %v3412_v0 = vld [vmem:[#allocation8 + $0x170] sm:$0xf0] }
  0xb8   :  { %v315_v62 = vadd.f32 %v314_v61, %v181_v54  ;;  %v3316_v54 = vld [vmem:[#allocation8 + $0xb0] sm:$0xf0] }
  0xb9   :  { %v340_v1 = vpop.f32.mrf.mxu0  ;;  %v391_v4 = vunpack.c.l.bf16 %v383_v63  ;;  %v4668_v63 = vld [vmem:[#allocation8 + $0x164] sm:$0xf] }
  0xba   :  { %v385_v2 = vpack.c.bf16 %v315_v62, %v315_v62  ;;  %v341_v12 = vadd.f32 %v340_v1, %v183_v3  ;;  %v3319_v62 = vor.u32 %v4644_v53, %v3316_v54  ;;  %v4640_v3 = vld [vmem:[#allocation8 + $0x84] sm:$0xf] }
  0xbb   :  { %4989 = vtanh.f32 %v391_v4  ;;  %v4988_v8 = vpop.eup %4987  ;;  %v3300_v4 = vld [vmem:[#allocation8 + $0x90] sm:$0xf0]  ;;  %v4628_v53 = vld [vmem:[#allocation8 + $0x24] sm:$0xf] }
  0xbc   :  { %v393_v7 = vunpack.c.l.bf16 %v385_v2  ;;  %v290_v9 = vpop.f32.mrf.mxu3  ;;  %v5371_v13 = vpack.c.bf16 %v4988_v8, %v4988_v8  ;;  %v387_v26 = vpack.c.bf16 %v341_v12, %v341_v12  ;;  %v3575_v2 = vor.u32 %v4708_v56, %v3572_v57  ;;  %v4664_v12 = vld [vmem:[#allocation8 + $0x144] sm:$0xf]  ;;  %v3252_v56 = vld [vmem:[#allocation8 + $0x30] sm:$0xf0] }
  0xbd   :  { %v3415_v9 = vor.u32 %v4668_v63, %v3412_v0  ;;  %v4692_v57 = vld [vmem:[#allocation8 + $0x224] sm:$0xf] }
  0xbe   :  { %4991 = vtanh.f32 %v393_v7  ;;  %v353_v19 = vpop.f32.mrf.mxu1  ;;  %1982 = vmatmul.bf16.vlgmr.msra.gmra.mxu1 %v5371_v13  ;;  %v395_v44 = vunpack.c.l.bf16 %v387_v26  ;;  %v4808_v0 = vld [vmem:[#allocation8 + $0x5c4] sm:$0xf] }
  0xbf   :  { %v316_v14 = vpop.f32.mrf.mxu2  ;;  %v354_v23 = vadd.f32 %v353_v19, %v184_v10  ;;  %2078 = vmatpush.bf16.msra.mxu1 %v3479_v11  ;;  %v3303_v11 = vor.u32 %v4640_v3, %v3300_v4  ;;  %v3284_v19 = vld [vmem:[#allocation8 + $0x70] sm:$0xf0]  ;;  %v4624_v4 = vld [vmem:[#allocation8 + $0x4] sm:$0xf] }
  0xc0   :  { %v3396_v14 = vld [vmem:[#allocation8 + $0x150] sm:$0xf0] }
  0xc1   :  { %v342_v22 = vpop.f32.mrf.mxu0  ;;  %v4990_v27 = vpop.eup %4989  ;;  %v388_v33 = vpack.c.bf16 %v354_v23, %v354_v23  ;;  %v4748_v23 = vld [vmem:[#allocation8 + $0x3e4] sm:$0xf]  ;;  %v3972_v3 = vld [vmem:[#allocation8 + $0x5d0] sm:$0xf0] }
  0xc2   :  { %v5375_v32 = vpack.c.bf16 %v4990_v27, %v4990_v27  ;;  %v3399_v22 = vor.u32 %v4664_v12, %v3396_v14  ;;  %v4780_v14 = vld [vmem:[#allocation8 + $0x4e4] sm:$0xf] }
  0xc3   :  { %v396_v41 = vunpack.c.l.bf16 %v388_v33  ;;  %2079 = vmatpush.bf16.msra.mxu1 %v3463_v24  ;;  %v3732_v24 = vld [vmem:[#allocation8 + $0x3f0] sm:$0xf0]  ;;  %v3287_v33 = vor.u32 %v4636_v18, %v3284_v19  ;;  %v3239_v19 = vor.u32 %v4624_v4, %v3236_v5  ;;  %v4720_v4 = vld [vmem:[#allocation8 + $0x304] sm:$0xf] }
  0xc4   :  { %v4992_v31 = vpop.eup %4991  ;;  %v327_v43 = vpop.f32.mrf.mxu3  ;;  %1969 = vmatmul.bf16.vlgmr.msrb.gmra.mxu0 %v5375_v32  ;;  %v3735_v37 = vor.u32 %v4748_v23, %v3732_v24  ;;  %v4116_v18 = vld [vmem:[#allocation8 + $0x6f0] sm:$0xf0] }
  0xc5   :  { %v5378_v38 = vpack.c.bf16 %v4992_v31, %v4992_v31  ;;  %v328_v46 = vadd.f32 %v327_v43, %v182_v28  ;;  %2065 = vmatpush.bf16.msrb.mxu0 %v3351_v29  ;;  %4993 = vtanh.f32 %v396_v41  ;;  %v186_v28 = vperm.slane %v5364_v42, 7  ;;  %v4660_v29 = vld [vmem:[#allocation8 + $0x124] sm:$0xf]  ;;  %v3524_v41 = vld [vmem:[#allocation8 + $0x250] sm:$0xf0] }
  0xc6   :  { %v355_v58 = vpop.f32.mrf.mxu1  ;;  %4995 = vtanh.f32 %v395_v44  ;;  %v3383_v42 = vor.u32 %v4660_v29, %v3380_v25  ;;  %v4744_v44 = vld [vmem:[#allocation8 + $0x3c4] sm:$0xf]  ;;  %v3527_v50 = vor.u32 %v4696_v40, %v3524_v41  ;;  %v3668_v29 = vld [vmem:[#allocation8 + $0x370] sm:$0xf0] }
  0xc7   :  { %v366_v47 = vpop.f32.mrf.mxu2  ;;  %1995 = vmatmul.bf16.vlgmr.msra.gmra.mxu2 %v5378_v38  ;;  %v386_v55 = vpack.c.bf16 %v328_v46, %v328_v46  ;;  %2080 = vmatpush.bf16.msra.mxu1 %v3447_v45  ;;  %v3716_v45 = vld [vmem:[#allocation8 + $0x3d0] sm:$0xf0]  ;;  %v4776_v25 = vld [vmem:[#allocation8 + $0x4c4] sm:$0xf] }
  0xc8   :  { %v367_v51 = vadd.f32 %v366_v47, %v185_v34  ;;  %2091 = vmatpush.bf16.msra.mxu2 %v3607_v35  ;;  %v3543_v34 = vor.u32 %v4700_v20, %v3540_v21  ;;  %v4632_v35 = vld [vmem:[#allocation8 + $0x44] sm:$0xf]  ;;  %v3508_v58 = vld [vmem:[#allocation8 + $0x230] sm:$0xf0] }
  0xc9   :  { %v394_v61 = vunpack.c.l.bf16 %v386_v55  ;;  %2066 = vmatpush.bf16.msrb.mxu0 %v3335_v48  ;;  %v4656_v47 = vld [vmem:[#allocation8 + $0x104] sm:$0xf]  ;;  %v3364_v48 = vld [vmem:[#allocation8 + $0x110] sm:$0xf0]  ;;  %v3271_v49 = vor.u32 %v4632_v35, %v3268_v39  ;;  %v3719_v55 = vor.u32 %v4744_v44, %v3716_v45 }
  0xca   :  { %v389_v59 = vpack.c.bf16 %v367_v51, %v367_v51  ;;  %v4812_v51 = vld [vmem:[#allocation8 + $0x5e4] sm:$0xf]  ;;  %v3940_v41 = vld [vmem:[#allocation8 + $0x590] sm:$0xf0] }
  0xcb   :  { %4997 = vtanh.f32 %v394_v61  ;;  %v4994_v7 = vpop.eup %4993  ;;  %2081 = vmatpush.bf16.msra.mxu1 %v3431_v60  ;;  %v4740_v60 = vld [vmem:[#allocation8 + $0x3a4] sm:$0xf]  ;;  %v3700_v61 = vld [vmem:[#allocation8 + $0x3b0] sm:$0xf0] }
  0xcc   :  { %v397_v1 = vunpack.c.l.bf16 %v389_v59  ;;  %2092 = vmatpush.bf16.msra.mxu2 %v3591_v52  ;;  %v329_v8 = vpop.f32.mrf.mxu3  ;;  %v5382_v10 = vpack.c.bf16 %v4994_v7, %v4994_v7  ;;  %v4996_v16 = vpop.eup %4995  ;;  %v3988_v52 = vld [vmem:[#allocation8 + $0x5f0] sm:$0xf0]  ;;  %v3367_v59 = vor.u32 %v4656_v47, %v3364_v48  ;;  %v3703_v6 = vor.u32 %v4740_v60, %v3700_v61  ;;  %v4688_v7 = vld [vmem:[#allocation8 + $0x204] sm:$0xf] }
  0xcd   :  { %2067 = vmatpush.bf16.msrb.mxu0 %v3319_v62  ;;  %v5385_v27 = vpack.c.bf16 %v4996_v16, %v4996_v16  ;;  %v3991_v63 = vor.u32 %v4812_v51, %v3988_v52  ;;  %v3492_v8 = vld [vmem:[#allocation8 + $0x210] sm:$0xf0]  ;;  %v3975_v16 = vor.u32 %v4808_v0, %v3972_v3  ;;  %v4804_v21 = vld [vmem:[#allocation8 + $0x5a4] sm:$0xf] }
  0xce   :  { %4999 = vtanh.f32 %v397_v1  ;;  %2034 = vmatmul.bf16.vlgmr.msrb.gmra.mxu1 %v5382_v10  ;;  %v3255_v1 = vor.u32 %v4628_v53, %v3252_v56  ;;  %v3495_v20 = vor.u32 %v4688_v7, %v3492_v8  ;;  %v4840_v35 = vld [vmem:[#allocation8 + $0x6c4] sm:$0xf]  ;;  %v3828_v48 = vld [vmem:[#allocation8 + $0x4b0] sm:$0xf0] }
  0xcf   :  { %v368_v15 = vpop.f32.mrf.mxu2  ;;  %2082 = vmatpush.bf16.msra.mxu1 %v3415_v9  ;;  %v4736_v9 = vld [vmem:[#allocation8 + $0x384] sm:$0xf]  ;;  %v4084_v51 = vld [vmem:[#allocation8 + $0x6b0] sm:$0xf0] }
  0xd0   :  { %2093 = vmatpush.bf16.msra.mxu2 %v3575_v2  ;;  %v3511_v2 = vor.u32 %v4692_v57, %v3508_v58  ;;  %v3860_v15 = vld [vmem:[#allocation8 + $0x4f0] sm:$0xf0]  ;;  %v4800_v40 = vld [vmem:[#allocation8 + $0x584] sm:$0xf] }
  0xd1   :  { %v4998_v26 = vpop.eup %4997  ;;  %2068 = vmatpush.bf16.msrb.mxu0 %v3303_v11  ;;  %v3684_v11 = vld [vmem:[#allocation8 + $0x390] sm:$0xf0]  ;;  %v3863_v24 = vor.u32 %v4780_v14, %v3860_v15  ;;  %v4728_v44 = vld [vmem:[#allocation8 + $0x344] sm:$0xf] }
  0xd2   :  { %v5388_v31 = vpack.c.bf16 %v4998_v26, %v4998_v26  ;;  %v3687_v23 = vor.u32 %v4736_v9, %v3684_v11  ;;  %v4732_v26 = vld [vmem:[#allocation8 + $0x364] sm:$0xf]  ;;  %v3924_v53 = vld [vmem:[#allocation8 + $0x570] sm:$0xf0] }
  0xd3   :  { %2083 = vmatpush.bf16.msra.mxu1 %v3399_v22  ;;  %v3956_v22 = vld [vmem:[#allocation8 + $0x5b0] sm:$0xf0]  ;;  %v4772_v47 = vld [vmem:[#allocation8 + $0x4a4] sm:$0xf] }
  0xd4   :  { %v5000_v30 = vpop.eup %4999  ;;  %2094 = vmatpush.bf16.msra.mxu2 %v3559_v17  ;;  %v379_v43 = vpop.f32.mrf.mxu3  ;;  %2008 = vmatmul.bf16.vlgmr.msrb.gmra.mxu3 %v5388_v31  ;;  %v4844_v17 = vld [vmem:[#allocation8 + $0x6e4] sm:$0xf]  ;;  %v3636_v58 = vld [vmem:[#allocation8 + $0x330] sm:$0xf0] }
  0xd5   :  { %v5390_v36 = vpack.c.bf16 %v5000_v30, %v5000_v30  ;;  %v380_v46 = vadd.f32 %v379_v43, %v186_v28  ;;  %2021 = vmatmul.bf16.vlgmr.msra.gmra.mxu0 %v5385_v27  ;;  %2104 = vmatpush.bf16.msrb.mxu3 %v3735_v37  ;;  %v4119_v28 = vor.u32 %v4844_v17, %v4116_v18  ;;  %v3844_v30 = vld [vmem:[#allocation8 + $0x4d0] sm:$0xf0]  ;;  %v4796_v52 = vld [vmem:[#allocation8 + $0x564] sm:$0xf] }
  0xd6   :  { %2069 = vmatpush.bf16.msrb.mxu0 %v3287_v33  ;;  %v4100_v37 = vld [vmem:[#allocation8 + $0x6d0] sm:$0xf0]  ;;  %v3671_v43 = vor.u32 %v4732_v26, %v3668_v29  ;;  %v4724_v56 = vld [vmem:[#allocation8 + $0x324] sm:$0xf]  ;;  %v3927_v61 = vor.u32 %v4796_v52, %v3924_v53  ;;  %v4683_v52 = vld [vmem:[#allocation8 + $0x1d4] sm:$0xf0] }
  0xd7   :  { %2047 = vmatmul.bf16.vlgmr.msrb.gmra.mxu2 %v5390_v36  ;;  %v390_v54 = vpack.c.bf16 %v380_v46, %v380_v46  ;;  %2084 = vmatpush.bf16.msra.mxu1 %v3383_v42  ;;  %v3847_v42 = vor.u32 %v4776_v25, %v3844_v30  ;;  %v4103_v45 = vor.u32 %v4840_v35, %v4100_v37  ;;  %v3652_v46 = vld [vmem:[#allocation8 + $0x350] sm:$0xf0]  ;;  %v4792_v0 = vld [vmem:[#allocation8 + $0x544] sm:$0xf]  ;;  %v3482_v35 = vld [vmem:[#allocation8 + $0x1e8] sm:$0xf] }
  0xd8   :  { %2095 = vmatpush.bf16.msra.mxu2 %v3543_v34  ;;  %v3959_v34 = vor.u32 %v4804_v21, %v3956_v22  ;;  %v3812_v60 = vld [vmem:[#allocation8 + $0x490] sm:$0xf0]  ;;  %v4764_v7 = vld [vmem:[#allocation8 + $0x464] sm:$0xf]  ;;  %v4687_v37 = vld [vmem:[#allocation8 + $0x1f4] sm:$0xf0] }
  0xd9   :  { %v398_v62 = vunpack.c.l.bf16 %v390_v54  ;;  %2105 = vmatpush.bf16.msrb.mxu3 %v3719_v55  ;;  %v3655_v54 = vor.u32 %v4728_v44, %v3652_v46  ;;  %v3831_v55 = vor.u32 %v4772_v47, %v3828_v48  ;;  %v3620_v5 = vld [vmem:[#allocation8 + $0x310] sm:$0xf0]  ;;  %v4828_v9 = vld [vmem:[#allocation8 + $0x664] sm:$0xf] }
  0xda   :  { %2070 = vmatpush.bf16.msrb.mxu0 %v3271_v49  ;;  %v3943_v49 = vor.u32 %v4800_v40, %v3940_v41  ;;  %v3796_v8 = vld [vmem:[#allocation8 + $0x470] sm:$0xf0]  ;;  %v4876_v14 = vld [vmem:[#allocation8 + $0x7e4] sm:$0xf]  ;;  %v3623_v18 = vor.u32 %v4720_v4, %v3620_v5  ;;  %v4679_v4 = vld [vmem:[#allocation8 + $0x1b4] sm:$0xf0] }
  0xdb   :  { %5001 = vtanh.f32 %v398_v62  ;;  %2085 = vmatpush.bf16.msra.mxu1 %v3367_v59  ;;  %v4768_v59 = vld [vmem:[#allocation8 + $0x484] sm:$0xf]  ;;  %v4244_v15 = vld [vmem:[#allocation8 + $0x7f0] sm:$0xf0] }
  0xdc   :  { %2096 = vmatpush.bf16.msra.mxu2 %v3527_v50  ;;  %v381_v12 = vpop.f32.mrf.mxu3  ;;  %v4836_v50 = vld [vmem:[#allocation8 + $0x6a4] sm:$0xf]  ;;  %v3815_v3 = vor.u32 %v4768_v59, %v3812_v60  ;;  %v3892_v17 = vld [vmem:[#allocation8 + $0x530] sm:$0xf0]  ;;  %v4247_v21 = vor.u32 %v4876_v14, %v4244_v15  ;;  %v4651_v15 = vld [vmem:[#allocation8 + $0xd4] sm:$0xf0] }
  0xdd   :  { %2106 = vmatpush.bf16.msrb.mxu3 %v3703_v6  ;;  %v4087_v57 = vor.u32 %v4836_v50, %v4084_v51  ;;  %v4832_v62 = vld [vmem:[#allocation8 + $0x684] sm:$0xf]  ;;  %v4052_v12 = vld [vmem:[#allocation8 + $0x670] sm:$0xf0]  ;;  %v3466_v51 = vld [vmem:[#allocation8 + $0x1c8] sm:$0xf] }
  0xde   :  { %2071 = vmatpush.bf16.msrb.mxu0 %v3255_v1  ;;  %2086 = vmatmul.bf16.vlgmr.msra.gmra.mxu1 %v5371_v13  ;;  %v3908_v1 = vld [vmem:[#allocation8 + $0x550] sm:$0xf0]  ;;  %v4760_v22 = vld [vmem:[#allocation8 + $0x444] sm:$0xf] }
  0xdf   :  { %2130 = vmatpush.bf16.msrb.mxu1 %v3991_v63  ;;  %v4068_v63 = vld [vmem:[#allocation8 + $0x690] sm:$0xf0]  ;;  %v3911_v11 = vor.u32 %v4792_v0, %v3908_v1  ;;  %v4872_v29 = vld [vmem:[#allocation8 + $0x7c4] sm:$0xf]  ;;  %v3610_v0 = vld [vmem:[#allocation8 + $0x2e8] sm:$0xf] }
  0xe0   :  { %2097 = vmatpush.bf16.msra.mxu2 %v3511_v2  ;;  %v3639_v2 = vor.u32 %v4724_v56, %v3636_v58  ;;  %v4071_v6 = vor.u32 %v4832_v62, %v4068_v63  ;;  %v4228_v25 = vld [vmem:[#allocation8 + $0x7d0] sm:$0xf0]  ;;  %v4784_v30 = vld [vmem:[#allocation8 + $0x504] sm:$0xf]  ;;  %v3467_v62 = vor.u32 %v4683_v52, %v3466_v51  ;;  %v4655_v63 = vld [vmem:[#allocation8 + $0xf4] sm:$0xf0] }
  0xe1   :  { %v5002_v33 = vpop.eup %5001  ;;  %2107 = vmatpush.bf16.msrb.mxu3 %v3687_v23  ;;  %v3780_v23 = vld [vmem:[#allocation8 + $0x450] sm:$0xf0]  ;;  %v4231_v41 = vor.u32 %v4872_v29, %v4228_v25  ;;  %v4820_v44 = vld [vmem:[#allocation8 + $0x624] sm:$0xf]  ;;  %v4719_v1 = vld [vmem:[#allocation8 + $0x2f4] sm:$0xf0] }
  0xe2   :  { %v5396_v39 = vpack.c.bf16 %v5002_v33, %v5002_v33  ;;  %2072 = vmatpush.bf16.msrb.mxu0 %v3239_v19  ;;  %v3799_v19 = vor.u32 %v4764_v7, %v3796_v8  ;;  %v3876_v33 = vld [vmem:[#allocation8 + $0x510] sm:$0xf0]  ;;  %v4868_v47 = vld [vmem:[#allocation8 + $0x7a4] sm:$0xf]  ;;  %v3611_v8 = vor.u32 %v4719_v1, %v3610_v0  ;;  %v4647_v29 = vld [vmem:[#allocation8 + $0xb4] sm:$0xf0] }
  0xe3   :  { %2131 = vmatpush.bf16.msrb.mxu1 %v3975_v16  ;;  %v4788_v16 = vld [vmem:[#allocation8 + $0x524] sm:$0xf]  ;;  %v4020_v46 = vld [vmem:[#allocation8 + $0x630] sm:$0xf0]  ;;  %v3578_v25 = vld [vmem:[#allocation8 + $0x2a8] sm:$0xf] }
  0xe4   :  { %2098 = vmatpush.bf16.msra.mxu2 %v3495_v20  ;;  %2060 = vmatmul.bf16.vlgmr.msra.gmra.mxu3 %v5396_v39  ;;  %v4055_v20 = vor.u32 %v4828_v9, %v4052_v12  ;;  %v3895_v26 = vor.u32 %v4788_v16, %v3892_v17  ;;  %v4212_v48 = vld [vmem:[#allocation8 + $0x7b0] sm:$0xf0]  ;;  %v4752_v53 = vld [vmem:[#allocation8 + $0x404] sm:$0xf]  ;;  %v3338_v12 = vld [vmem:[#allocation8 + $0xc8] sm:$0xf] }
  0xe5   :  { %2073 = vmatmul.bf16.vlgmr.msrb.gmra.mxu0 %v5375_v32  ;;  %2108 = vmatpush.bf16.msrb.mxu3 %v3671_v43  ;;  %v4756_v43 = vld [vmem:[#allocation8 + $0x424] sm:$0xf]  ;;  %v3748_v56 = vld [vmem:[#allocation8 + $0x410] sm:$0xf0]  ;;  %v3594_v16 = vld [vmem:[#allocation8 + $0x2c8] sm:$0xf] }
  0xe6   :  { %2117 = vmatpush.bf16.msra.mxu0 %v3863_v24  ;;  %v4824_v24 = vld [vmem:[#allocation8 + $0x644] sm:$0xf]  ;;  %v4004_v58 = vld [vmem:[#allocation8 + $0x610] sm:$0xf0]  ;;  %v4715_v17 = vld [vmem:[#allocation8 + $0x2d4] sm:$0xf0] }
  0xe7   :  { %2132 = vmatpush.bf16.msrb.mxu1 %v3959_v34  ;;  %2099 = vmatmul.bf16.vlgmr.msra.gmra.mxu2 %v5378_v38  ;;  %v3783_v34 = vor.u32 %v4760_v22, %v3780_v23  ;;  %v4864_v59 = vld [vmem:[#allocation8 + $0x784] sm:$0xf]  ;;  %v4196_v60 = vld [vmem:[#allocation8 + $0x790] sm:$0xf0]  ;;  %v3595_v22 = vor.u32 %v4715_v17, %v3594_v16  ;;  %v4815_v16 = vld [vmem:[#allocation8 + $0x5f4] sm:$0xf0] }
  0xe8   :  { %2143 = vmatpush.bf16.msrb.mxu2 %v4119_v28  ;;  %v4036_v28 = vld [vmem:[#allocation8 + $0x650] sm:$0xf0]  ;;  %v4860_v9 = vld [vmem:[#allocation8 + $0x764] sm:$0xf] }
  0xe9   :  { %2109 = vmatpush.bf16.msrb.mxu3 %v3655_v54  ;;  %v4039_v40 = vor.u32 %v4824_v24, %v4036_v28  ;;  %v4023_v54 = vor.u32 %v4820_v44, %v4020_v46  ;;  %v4856_v23 = vld [vmem:[#allocation8 + $0x744] sm:$0xf]  ;;  %v4164_v24 = vld [vmem:[#allocation8 + $0x750] sm:$0xf0]  ;;  %v3562_v46 = vld [vmem:[#allocation8 + $0x288] sm:$0xf] }
  0xea   :  { %2118 = vmatpush.bf16.msra.mxu0 %v3847_v42  ;;  %v3764_v42 = vld [vmem:[#allocation8 + $0x430] sm:$0xf0]  ;;  %v4848_v51 = vld [vmem:[#allocation8 + $0x704] sm:$0xf] }
  0xeb   :  { %2133 = vmatpush.bf16.msrb.mxu1 %v3943_v49  ;;  %v3483_v49 = vor.u32 %v4687_v37, %v3482_v35  ;;  %v3767_v50 = vor.u32 %v4756_v43, %v3764_v42  ;;  %v4167_v35 = vor.u32 %v4856_v23, %v4164_v24  ;;  %v4148_v43 = vld [vmem:[#allocation8 + $0x730] sm:$0xf0]  ;;  %v3306_v42 = vld [vmem:[#allocation8 + $0x88] sm:$0xf]  ;;  %v4695_v24 = vld [vmem:[#allocation8 + $0x234] sm:$0xf0] }
  0xec   :  { %2144 = vmatpush.bf16.msrb.mxu2 %v4103_v45  ;;  %v3879_v45 = vor.u32 %v4784_v30, %v3876_v33  ;;  %v4711_v30 = vld [vmem:[#allocation8 + $0x2b4] sm:$0xf0]  ;;  %v3418_v33 = vld [vmem:[#allocation8 + $0x168] sm:$0xf] }
  0xed   :  { %2110 = vmatpush.bf16.msrb.mxu3 %v3639_v2  ;;  %v3751_v2 = vor.u32 %v4752_v53, %v3748_v56  ;;  %v4639_v56 = vld [vmem:[#allocation8 + $0x74] sm:$0xf0]  ;;  %v3514_v23 = vld [vmem:[#allocation8 + $0x228] sm:$0xf] }
  0xee   :  { %2119 = vmatpush.bf16.msra.mxu0 %v3831_v55  ;;  %v4215_v55 = vor.u32 %v4868_v47, %v4212_v48  ;;  %v4707_v47 = vld [vmem:[#allocation8 + $0x294] sm:$0xf0]  ;;  %v3402_v48 = vld [vmem:[#allocation8 + $0x148] sm:$0xf] }
  0xef   :  { %2134 = vmatpush.bf16.msrb.mxu1 %v3927_v61  ;;  %v3354_v61 = vld [vmem:[#allocation8 + $0xe8] sm:$0xf]  ;;  %v3563_v53 = vor.u32 %v4707_v47, %v3562_v46  ;;  %v4783_v47 = vld [vmem:[#allocation8 + $0x4f4] sm:$0xf0] }
  0xf0   :  { %2145 = vmatpush.bf16.msrb.mxu2 %v4087_v57  ;;  %v4816_v57 = vld [vmem:[#allocation8 + $0x604] sm:$0xf]  ;;  %v3355_v7 = vor.u32 %v4655_v63, %v3354_v61  ;;  %v4751_v61 = vld [vmem:[#allocation8 + $0x3f4] sm:$0xf0]  ;;  %v3866_v46 = vld [vmem:[#allocation8 + $0x4e8] sm:$0xf] }
  0xf1   :  { %2111 = vmatpush.bf16.msrb.mxu3 %v3623_v18  ;;  %v4007_v5 = vor.u32 %v4816_v57, %v4004_v58  ;;  %v3434_v18 = vld [vmem:[#allocation8 + $0x188] sm:$0xf]  ;;  %v4663_v63 = vld [vmem:[#allocation8 + $0x134] sm:$0xf0] }
  0xf2   :  { %2120 = vmatpush.bf16.msra.mxu0 %v3815_v3  ;;  %v3450_v3 = vld [vmem:[#allocation8 + $0x1a8] sm:$0xf] }
  0xf3   :  { %2135 = vmatpush.bf16.msrb.mxu1 %v3911_v11  ;;  %v4180_v11 = vld [vmem:[#allocation8 + $0x770] sm:$0xf0]  ;;  %v3451_v14 = vor.u32 %v4679_v4, %v3450_v3  ;;  %v3546_v58 = vld [vmem:[#allocation8 + $0x268] sm:$0xf]  ;;  %v4635_v4 = vld [vmem:[#allocation8 + $0x54] sm:$0xf0] }
  0xf4   :  { %2146 = vmatpush.bf16.msrb.mxu2 %v4071_v6  ;;  %2112 = vmatmul.bf16.vlgmr.msrb.gmra.mxu3 %v5388_v31  ;;  %v4199_v6 = vor.u32 %v4864_v59, %v4196_v60  ;;  %v4703_v59 = vld [vmem:[#allocation8 + $0x274] sm:$0xf0]  ;;  %v3738_v60 = vld [vmem:[#allocation8 + $0x3e8] sm:$0xf] }
  0xf5   :  { %2156 = vmatpush.bf16.msra.mxu3 %v4247_v21  ;;  %v3339_v21 = vor.u32 %v4651_v15, %v3338_v12  ;;  %v3274_v3 = vld [vmem:[#allocation8 + $0x48] sm:$0xf] }
  0xf6   :  { %2121 = vmatpush.bf16.msra.mxu0 %v3799_v19  ;;  %v4675_v19 = vld [vmem:[#allocation8 + $0x194] sm:$0xf0]  ;;  %v3370_v12 = vld [vmem:[#allocation8 + $0x108] sm:$0xf]  ;;  %v3275_v17 = vor.u32 %v4635_v4, %v3274_v3 }
  0xf7   :  { %2136 = vmatpush.bf16.msrb.mxu1 %v3895_v26  ;;  %v3322_v26 = vld [vmem:[#allocation8 + $0xa8] sm:$0xf]  ;;  %v3435_v28 = vor.u32 %v4675_v19, %v3434_v18 }
  0xf8   :  { %2147 = vmatpush.bf16.msrb.mxu2 %v4055_v20  ;;  %v4183_v20 = vor.u32 %v4860_v9, %v4180_v11  ;;  %v3323_v37 = vor.u32 %v4647_v29, %v3322_v26  ;;  %v3722_v9 = vld [vmem:[#allocation8 + $0x3c8] sm:$0xf]  ;;  %v4747_v11 = vld [vmem:[#allocation8 + $0x3d4] sm:$0xf0] }
  0xf9   :  { %2157 = vmatpush.bf16.msra.mxu3 %v4231_v41  ;;  %v4852_v41 = vld [vmem:[#allocation8 + $0x724] sm:$0xf]  ;;  %v3994_v15 = vld [vmem:[#allocation8 + $0x5e8] sm:$0xf]  ;;  %v4743_v29 = vld [vmem:[#allocation8 + $0x3b4] sm:$0xf0] }
  0xfa   :  { %2122 = vmatpush.bf16.msra.mxu0 %v3783_v34  ;;  %v4671_v34 = vld [vmem:[#allocation8 + $0x174] sm:$0xf0]  ;;  %v3258_v19 = vld [vmem:[#allocation8 + $0x28] sm:$0xf]  ;;  %v3995_v26 = vor.u32 %v4815_v16, %v3994_v15 }
  0xfb   :  { %2137 = vmatpush.bf16.msrb.mxu1 %v3879_v45  ;;  %v3419_v44 = vor.u32 %v4671_v34, %v3418_v33  ;;  %v4643_v45 = vld [vmem:[#allocation8 + $0x94] sm:$0xf0]  ;;  %v3515_v34 = vor.u32 %v4695_v24, %v3514_v23  ;;  %v3658_v4 = vld [vmem:[#allocation8 + $0x348] sm:$0xf] }
  0xfc   :  { %2148 = vmatpush.bf16.msrb.mxu2 %v4039_v40  ;;  %v3579_v40 = vor.u32 %v4711_v30, %v3578_v25  ;;  %v3307_v52 = vor.u32 %v4643_v45, %v3306_v42  ;;  %v3978_v25 = vld [vmem:[#allocation8 + $0x5c8] sm:$0xf]  ;;  %v4811_v30 = vld [vmem:[#allocation8 + $0x5d4] sm:$0xf0] }
  0xfd   :  { %2158 = vmatpush.bf16.msra.mxu3 %v4215_v55  ;;  %v3290_v55 = vld [vmem:[#allocation8 + $0x68] sm:$0xf]  ;;  %v3979_v45 = vor.u32 %v4811_v30, %v3978_v25  ;;  %v4799_v15 = vld [vmem:[#allocation8 + $0x574] sm:$0xf0] }
  0xfe   :  { %2123 = vmatpush.bf16.msra.mxu0 %v3767_v50  ;;  %2138 = vmatmul.bf16.vlgmr.msrb.gmra.mxu1 %v5382_v10  ;;  %v4151_v50 = vor.u32 %v4852_v41, %v4148_v43  ;;  %v3291_v1 = vor.u32 %v4639_v56, %v3290_v55  ;;  %v4691_v43 = vld [vmem:[#allocation8 + $0x214] sm:$0xf0]  ;;  %v3690_v42 = vld [vmem:[#allocation8 + $0x388] sm:$0xf]  ;;  %v3867_v55 = vor.u32 %v4783_v47, %v3866_v46 }
  0xff   :  { %2182 = vmatpush.bf16.msra.mxu1 %v3483_v49  ;;  %v4667_v49 = vld [vmem:[#allocation8 + $0x154] sm:$0xf0]  ;;  %v3674_v56 = vld [vmem:[#allocation8 + $0x368] sm:$0xf] }
 0x100   :  { %2149 = vmatpush.bf16.msrb.mxu2 %v4023_v54  ;;  %v4132_v54 = vld [vmem:[#allocation8 + $0x710] sm:$0xf0]  ;;  %v3403_v57 = vor.u32 %v4667_v49, %v3402_v48  ;;  %v4122_v48 = vld [vmem:[#allocation8 + $0x6e8] sm:$0xf]  ;;  %v4847_v49 = vld [vmem:[#allocation8 + $0x6f4] sm:$0xf0] }
 0x101   :  { %2159 = vmatpush.bf16.msra.mxu3 %v4199_v6  ;;  %v4135_v0 = vor.u32 %v4848_v51, %v4132_v54  ;;  %v4807_v51 = vld [vmem:[#allocation8 + $0x5b4] sm:$0xf0]  ;;  %v4074_v24 = vld [vmem:[#allocation8 + $0x688] sm:$0xf] }
 0x102   :  { %2124 = vmatpush.bf16.msra.mxu0 %v3751_v2  ;;  %v3547_v2 = vor.u32 %v4703_v59, %v3546_v58  ;;  %v4123_v58 = vor.u32 %v4847_v49, %v4122_v48  ;;  %v4771_v23 = vld [vmem:[#allocation8 + $0x494] sm:$0xf0]  ;;  %v3898_v46 = vld [vmem:[#allocation8 + $0x528] sm:$0xf] }
 0x103   :  { %2183 = vmatpush.bf16.msra.mxu1 %v3467_v62  ;;  %v3386_v62 = vld [vmem:[#allocation8 + $0x128] sm:$0xf]  ;;  %v4791_v47 = vld [vmem:[#allocation8 + $0x534] sm:$0xf0] }
 0x104   :  { %2150 = vmatpush.bf16.msrb.mxu2 %v4007_v5  ;;  %v3739_v5 = vor.u32 %v4751_v61, %v3738_v60  ;;  %v3387_v6 = vor.u32 %v4663_v63, %v3386_v62  ;;  %v3850_v60 = vld [vmem:[#allocation8 + $0x4c8] sm:$0xf]  ;;  %v4779_v61 = vld [vmem:[#allocation8 + $0x4d4] sm:$0xf0] }
 0x105   :  { %2125 = vmatmul.bf16.vlgmr.msra.gmra.mxu0 %v5385_v27  ;;  %2160 = vmatpush.bf16.msra.mxu3 %v4183_v20  ;;  %v3723_v20 = vor.u32 %v4747_v11, %v3722_v9  ;;  %v4106_v62 = vld [vmem:[#allocation8 + $0x6c8] sm:$0xf]  ;;  %v4843_v63 = vld [vmem:[#allocation8 + $0x6d4] sm:$0xf0]  ;;  %v3851_v3 = vor.u32 %v4779_v61, %v3850_v60 }
 0x106   :  { %2169 = vmatpush.bf16.msrb.mxu0 %v3355_v7  ;;  %v3530_v7 = vld [vmem:[#allocation8 + $0x248] sm:$0xf]  ;;  %v4775_v9 = vld [vmem:[#allocation8 + $0x4b4] sm:$0xf0] }
 0x107   :  { %2184 = vmatpush.bf16.msra.mxu1 %v3451_v14  ;;  %2151 = vmatmul.bf16.vlgmr.msrb.gmra.mxu2 %v5390_v36  ;;  %v4659_v14 = vld [vmem:[#allocation8 + $0x114] sm:$0xf0]  ;;  %v4090_v11 = vld [vmem:[#allocation8 + $0x6a8] sm:$0xf] }
 0x108   :  { %2195 = vmatpush.bf16.msra.mxu2 %v3611_v8  ;;  %v4699_v8 = vld [vmem:[#allocation8 + $0x254] sm:$0xf0] }
 0x109   :  { %2161 = vmatpush.bf16.msra.mxu3 %v4167_v35  ;;  %v3531_v18 = vor.u32 %v4699_v8, %v3530_v7  ;;  %v3242_v35 = vld [vmem:[#allocation8 + $0x8] sm:$0xf]  ;;  %v4787_v60 = vld [vmem:[#allocation8 + $0x514] sm:$0xf0] }
 0x10a   :  { %2170 = vmatpush.bf16.msrb.mxu0 %v3339_v21  ;;  %v3371_v21 = vor.u32 %v4659_v14, %v3370_v12  ;;  %v3834_v8 = vld [vmem:[#allocation8 + $0x4a8] sm:$0xf]  ;;  %v4839_v12 = vld [vmem:[#allocation8 + $0x6b4] sm:$0xf0] }
 0x10b   :  { %2185 = vmatpush.bf16.msra.mxu1 %v3435_v28  ;;  %v3706_v28 = vld [vmem:[#allocation8 + $0x3a8] sm:$0xf] }
 0x10c   :  { %2196 = vmatpush.bf16.msra.mxu2 %v3595_v22  ;;  %v4631_v22 = vld [vmem:[#allocation8 + $0x34] sm:$0xf0]  ;;  %v3707_v41 = vor.u32 %v4743_v29, %v3706_v28  ;;  %v3930_v14 = vld [vmem:[#allocation8 + $0x568] sm:$0xf] }
 0x10d   :  { %2162 = vmatpush.bf16.msra.mxu3 %v4151_v50  ;;  %v3259_v33 = vor.u32 %v4631_v22, %v3258_v19  ;;  %v3962_v50 = vld [vmem:[#allocation8 + $0x5a8] sm:$0xf]  ;;  %v4727_v19 = vld [vmem:[#allocation8 + $0x334] sm:$0xf0] }
 0x10e   :  { %2171 = vmatpush.bf16.msrb.mxu0 %v3323_v37  ;;  %v4627_v37 = vld [vmem:[#allocation8 + $0x14] sm:$0xf0]  ;;  %v3963_v59 = vor.u32 %v4807_v51, %v3962_v50  ;;  %v3818_v22 = vld [vmem:[#allocation8 + $0x488] sm:$0xf] }
 0x10f   :  { %2186 = vmatpush.bf16.msra.mxu1 %v3419_v44  ;;  %v4739_v44 = vld [vmem:[#allocation8 + $0x394] sm:$0xf0]  ;;  %v3914_v28 = vld [vmem:[#allocation8 + $0x548] sm:$0xf]  ;;  %v3819_v30 = vor.u32 %v4771_v23, %v3818_v22  ;;  %v4653_v23 = vld [vmem:[#allocation8 + $0xec] sm:$0xf] }
 0x110   :  { %2197 = vmatpush.bf16.msra.mxu2 %v3579_v40  ;;  %v3498_v40 = vld [vmem:[#allocation8 + $0x208] sm:$0xf]  ;;  %v3691_v54 = vor.u32 %v4739_v44, %v3690_v42  ;;  %v4795_v29 = vld [vmem:[#allocation8 + $0x554] sm:$0xf0] }
 0x111   :  { %2163 = vmatpush.bf16.msra.mxu3 %v4135_v0  ;;  %v3946_v0 = vld [vmem:[#allocation8 + $0x588] sm:$0xf]  ;;  %v4831_v42 = vld [vmem:[#allocation8 + $0x674] sm:$0xf0] }
 0x112   :  { %2172 = vmatpush.bf16.msrb.mxu0 %v3307_v52  ;;  %v3243_v52 = vor.u32 %v4627_v37, %v3242_v35  ;;  %v3915_v37 = vor.u32 %v4795_v29, %v3914_v28  ;;  %v4250_v44 = vld [vmem:[#allocation8 + $0x7e8] sm:$0xf]  ;;  %v4867_v22 = vld [vmem:[#allocation8 + $0x794] sm:$0xf0]  ;;  %v4717_v28 = vld [vmem:[#allocation8 + $0x2ec] sm:$0xf] }
 0x113   :  { %2187 = vmatpush.bf16.msra.mxu1 %v3403_v57  ;;  %v4735_v57 = vld [vmem:[#allocation8 + $0x374] sm:$0xf0]  ;;  %v3612_v29 = vld [vmem:[#allocation8 + $0x2f8] sm:$0xf0] }
 0x114   :  { %2198 = vmatpush.bf16.msra.mxu2 %v3563_v53  ;;  %2164 = vmatmul.bf16.vlgmr.msra.gmra.mxu3 %v5396_v39  ;;  %v3499_v53 = vor.u32 %v4691_v43, %v3498_v40  ;;  %v3802_v40 = vld [vmem:[#allocation8 + $0x468] sm:$0xf] }
 0x115   :  { %2208 = vmatpush.bf16.msrb.mxu3 %v3739_v5  ;;  %v4731_v5 = vld [vmem:[#allocation8 + $0x354] sm:$0xf0]  ;;  %v4058_v43 = vld [vmem:[#allocation8 + $0x668] sm:$0xf] }
 0x116   :  { %2173 = vmatpush.bf16.msrb.mxu0 %v3291_v1  ;;  %v4803_v1 = vld [vmem:[#allocation8 + $0x594] sm:$0xf0]  ;;  %v3659_v16 = vor.u32 %v4731_v5, %v3658_v4  ;;  %v4059_v50 = vor.u32 %v4831_v42, %v4058_v43  ;;  %v4026_v4 = vld [vmem:[#allocation8 + $0x628] sm:$0xf]  ;;  %v4649_v42 = vld [vmem:[#allocation8 + $0xcc] sm:$0xf] }
 0x117   :  { %2188 = vmatpush.bf16.msra.mxu1 %v3387_v6  ;;  %v4107_v6 = vor.u32 %v4843_v63, %v4106_v62  ;;  %v3947_v7 = vor.u32 %v4803_v1, %v3946_v0  ;;  %v4685_v62 = vld [vmem:[#allocation8 + $0x1ec] sm:$0xf]  ;;  %v3484_v63 = vld [vmem:[#allocation8 + $0x1f8] sm:$0xf0]  ;;  %v4863_v43 = vld [vmem:[#allocation8 + $0x774] sm:$0xf0] }
 0x118   :  { %2199 = vmatpush.bf16.msra.mxu2 %v3547_v2  ;;  %v3675_v2 = vor.u32 %v4735_v57, %v3674_v56  ;;  %v4827_v56 = vld [vmem:[#allocation8 + $0x654] sm:$0xf0]  ;;  %v4234_v57 = vld [vmem:[#allocation8 + $0x7c8] sm:$0xf] }
 0x119   :  { %2209 = vmatpush.bf16.msrb.mxu3 %v3723_v20  ;;  %v4091_v20 = vor.u32 %v4839_v12, %v4090_v11  ;;  %v4681_v12 = vld [vmem:[#allocation8 + $0x1cc] sm:$0xf] }
 0x11a   :  { %2174 = vmatpush.bf16.msrb.mxu0 %v3275_v17  ;;  %v3835_v17 = vor.u32 %v4775_v9, %v3834_v8  ;;  %v4871_v8 = vld [vmem:[#allocation8 + $0x7b4] sm:$0xf0]  ;;  %v3487_v9 = vor.u32 %v4685_v62, %v3484_v63  ;;  %v3420_v62 = vld [vmem:[#allocation8 + $0x178] sm:$0xf0] }
 0x11b   :  { %2189 = vmatpush.bf16.msra.mxu1 %v3371_v21  ;;  %v3931_v21 = vor.u32 %v4799_v15, %v3930_v14  ;;  %v3468_v14 = vld [vmem:[#allocation8 + $0x1d8] sm:$0xf0]  ;;  %v3754_v15 = vld [vmem:[#allocation8 + $0x408] sm:$0xf] }
 0x11c   :  { %2200 = vmatpush.bf16.msra.mxu2 %v3531_v18  ;;  %v3642_v18 = vld [vmem:[#allocation8 + $0x328] sm:$0xf] }
 0x11d   :  { %2210 = vmatpush.bf16.msrb.mxu3 %v3707_v41  ;;  %v3643_v25 = vor.u32 %v4727_v19, %v3642_v18  ;;  %v4767_v41 = vld [vmem:[#allocation8 + $0x474] sm:$0xf0]  ;;  %v4010_v19 = vld [vmem:[#allocation8 + $0x608] sm:$0xf] }
 0x11e   :  { %2175 = vmatpush.bf16.msrb.mxu0 %v3259_v33  ;;  %2190 = vmatmul.bf16.vlgmr.msra.gmra.mxu1 %v5371_v13  ;;  %v3626_v33 = vld [vmem:[#allocation8 + $0x308] sm:$0xf]  ;;  %v3803_v49 = vor.u32 %v4767_v41, %v3802_v40  ;;  %v4755_v18 = vld [vmem:[#allocation8 + $0x414] sm:$0xf0]  ;;  %v3615_v40 = vor.u32 %v4717_v28, %v3612_v29  ;;  %v3740_v28 = vld [vmem:[#allocation8 + $0x3f8] sm:$0xf0] }
 0x11f   :  { %2234 = vmatpush.bf16.msrb.mxu1 %v3995_v26  ;;  %v4835_v26 = vld [vmem:[#allocation8 + $0x694] sm:$0xf0]  ;;  %v4186_v41 = vld [vmem:[#allocation8 + $0x768] sm:$0xf]  ;;  %v4661_v29 = vld [vmem:[#allocation8 + $0x12c] sm:$0xf] }
 0x120   :  { %2201 = vmatpush.bf16.msra.mxu2 %v3515_v34  ;;  %v4723_v34 = vld [vmem:[#allocation8 + $0x314] sm:$0xf0]  ;;  %v4075_v35 = vor.u32 %v4835_v26, %v4074_v24  ;;  %v3471_v24 = vor.u32 %v4681_v12, %v3468_v14  ;;  %v3356_v26 = vld [vmem:[#allocation8 + $0xf8] sm:$0xf0] }
 0x121   :  { %2211 = vmatpush.bf16.msrb.mxu3 %v3691_v54  ;;  %v3627_v48 = vor.u32 %v4723_v34, %v3626_v33  ;;  %v4042_v54 = vld [vmem:[#allocation8 + $0x648] sm:$0xf]  ;;  %v3452_v33 = vld [vmem:[#allocation8 + $0x1b8] sm:$0xf0] }
 0x122   :  { %2176 = vmatpush.bf16.msrb.mxu0 %v3243_v52  ;;  %v3786_v52 = vld [vmem:[#allocation8 + $0x448] sm:$0xf]  ;;  %v4043_v0 = vor.u32 %v4827_v56, %v4042_v54  ;;  %v4645_v56 = vld [vmem:[#allocation8 + $0xac] sm:$0xf]  ;;  %v3404_v12 = vld [vmem:[#allocation8 + $0x158] sm:$0xf0] }
 0x123   :  { %2235 = vmatpush.bf16.msrb.mxu1 %v3979_v45  ;;  %v4879_v45 = vld [vmem:[#allocation8 + $0x7f4] sm:$0xf0]  ;;  %v4170_v54 = vld [vmem:[#allocation8 + $0x748] sm:$0xf] }
 0x124   :  { %2202 = vmatpush.bf16.msra.mxu2 %v3499_v53  ;;  %v4251_v51 = vor.u32 %v4879_v45, %v4250_v44  ;;  %v4763_v53 = vld [vmem:[#allocation8 + $0x454] sm:$0xf0]  ;;  %v3340_v45 = vld [vmem:[#allocation8 + $0xd8] sm:$0xf0] }
 0x125   :  { %2177 = vmatmul.bf16.vlgmr.msrb.gmra.mxu0 %v5375_v32  ;;  %2212 = vmatpush.bf16.msrb.mxu3 %v3675_v2  ;;  %v3787_v61 = vor.u32 %v4763_v53, %v3786_v52  ;;  %v3770_v2 = vld [vmem:[#allocation8 + $0x428] sm:$0xf]  ;;  %v3343_v52 = vor.u32 %v4649_v42, %v3340_v45  ;;  %v3532_v45 = vld [vmem:[#allocation8 + $0x258] sm:$0xf0] }
 0x126   :  { %2221 = vmatpush.bf16.msra.mxu0 %v3867_v55  ;;  %v3899_v55 = vor.u32 %v4791_v47, %v3898_v46  ;;  %v4713_v46 = vld [vmem:[#allocation8 + $0x2cc] sm:$0xf]  ;;  %v3596_v47 = vld [vmem:[#allocation8 + $0x2d8] sm:$0xf0] }
 0x127   :  { %2236 = vmatpush.bf16.msrb.mxu1 %v3963_v59  ;;  %2203 = vmatmul.bf16.vlgmr.msra.gmra.mxu2 %v5378_v38  ;;  %v3882_v59 = vld [vmem:[#allocation8 + $0x508] sm:$0xf]  ;;  %v3599_v53 = vor.u32 %v4713_v46, %v3596_v47  ;;  %v4745_v46 = vld [vmem:[#allocation8 + $0x3cc] sm:$0xf]  ;;  %v3724_v47 = vld [vmem:[#allocation8 + $0x3d8] sm:$0xf0] }
 0x128   :  { %2247 = vmatpush.bf16.msrb.mxu2 %v4123_v58  ;;  %v4875_v58 = vld [vmem:[#allocation8 + $0x7d4] sm:$0xf0]  ;;  %v3883_v5 = vor.u32 %v4787_v60, %v3882_v59  ;;  %v4709_v59 = vld [vmem:[#allocation8 + $0x2ac] sm:$0xf]  ;;  %v3580_v60 = vld [vmem:[#allocation8 + $0x2b8] sm:$0xf0] }
 0x129   :  { %2213 = vmatpush.bf16.msrb.mxu3 %v3659_v16  ;;  %v4235_v1 = vor.u32 %v4875_v58, %v4234_v57  ;;  %v3324_v58 = vld [vmem:[#allocation8 + $0xb8] sm:$0xf0] }
 0x12a   :  { %2222 = vmatpush.bf16.msra.mxu0 %v3851_v3  ;;  %v4759_v3 = vld [vmem:[#allocation8 + $0x434] sm:$0xf0] }
 0x12b   :  { %2237 = vmatpush.bf16.msrb.mxu1 %v3947_v7  ;;  %v4218_v7 = vld [vmem:[#allocation8 + $0x7a8] sm:$0xf]  ;;  %v3771_v11 = vor.u32 %v4759_v3, %v3770_v2  ;;  %v4855_v3 = vld [vmem:[#allocation8 + $0x734] sm:$0xf0] }
 0x12c   :  { %2248 = vmatpush.bf16.msrb.mxu2 %v4107_v6  ;;  %v4823_v6 = vld [vmem:[#allocation8 + $0x634] sm:$0xf0]  ;;  %v4154_v2 = vld [vmem:[#allocation8 + $0x728] sm:$0xf] }
 0x12d   :  { %2214 = vmatpush.bf16.msrb.mxu3 %v3643_v25  ;;  %v4027_v16 = vor.u32 %v4823_v6, %v4026_v4  ;;  %v3755_v25 = vor.u32 %v4755_v18, %v3754_v15  ;;  %v4641_v4 = vld [vmem:[#allocation8 + $0x8c] sm:$0xf]  ;;  %v4155_v14 = vor.u32 %v4855_v3, %v4154_v2  ;;  %v4138_v15 = vld [vmem:[#allocation8 + $0x708] sm:$0xf]  ;;  %v3980_v2 = vld [vmem:[#allocation8 + $0x5d8] sm:$0xf0] }
 0x12e   :  { %2223 = vmatpush.bf16.msra.mxu0 %v3835_v17  ;;  %v4219_v17 = vor.u32 %v4871_v8, %v4218_v7  ;;  %v3308_v7 = vld [vmem:[#allocation8 + $0x98] sm:$0xf0]  ;;  %v4705_v8 = vld [vmem:[#allocation8 + $0x28c] sm:$0xf] }
 0x12f   :  { %2238 = vmatpush.bf16.msrb.mxu1 %v3931_v21  ;;  %v4202_v21 = vld [vmem:[#allocation8 + $0x788] sm:$0xf] }
 0x130   :  { %2249 = vmatpush.bf16.msrb.mxu2 %v4091_v20  ;;  %v4819_v20 = vld [vmem:[#allocation8 + $0x614] sm:$0xf0] }
 0x131   :  { %2215 = vmatpush.bf16.msrb.mxu3 %v3627_v48  ;;  %v4011_v34 = vor.u32 %v4819_v20, %v4010_v19  ;;  %v4673_v48 = vld [vmem:[#allocation8 + $0x18c] sm:$0xf]  ;;  %v4851_v19 = vld [vmem:[#allocation8 + $0x714] sm:$0xf0] }
 0x132   :  { %2224 = vmatpush.bf16.msra.mxu0 %v3819_v30  ;;  %v4677_v30 = vld [vmem:[#allocation8 + $0x1ac] sm:$0xf] }
 0x133   :  { %2239 = vmatpush.bf16.msrb.mxu1 %v3915_v37  ;;  %v3359_v37 = vor.u32 %v4653_v23, %v3356_v26  ;;  %v3455_v44 = vor.u32 %v4677_v30, %v3452_v33  ;;  %v4637_v20 = vld [vmem:[#allocation8 + $0x6c] sm:$0xf]  ;;  %v4139_v30 = vor.u32 %v4851_v19, %v4138_v15  ;;  %v3692_v15 = vld [vmem:[#allocation8 + $0x398] sm:$0xf0] }
 0x134   :  { %2250 = vmatpush.bf16.msrb.mxu2 %v4075_v35  ;;  %2216 = vmatmul.bf16.vlgmr.msrb.gmra.mxu3 %v5388_v31  ;;  %v4203_v35 = vor.u32 %v4867_v22, %v4202_v21  ;;  %v3292_v21 = vld [vmem:[#allocation8 + $0x78] sm:$0xf0]  ;;  %v4701_v23 = vld [vmem:[#allocation8 + $0x26c] sm:$0xf] }
 0x135   :  { %2260 = vmatpush.bf16.msra.mxu3 %v4251_v51  ;;  %v4749_v26 = vld [vmem:[#allocation8 + $0x3ec] sm:$0xf]  ;;  %v3868_v19 = vld [vmem:[#allocation8 + $0x4f8] sm:$0xf0] }
 0x136   :  { %2225 = vmatpush.bf16.msra.mxu0 %v3803_v49  ;;  %v3436_v49 = vld [vmem:[#allocation8 + $0x198] sm:$0xf0] }
 0x137   :  { %2240 = vmatpush.bf16.msrb.mxu1 %v3899_v55  ;;  %v4859_v55 = vld [vmem:[#allocation8 + $0x754] sm:$0xf0]  ;;  %v3439_v57 = vor.u32 %v4673_v48, %v3436_v49  ;;  %v4657_v48 = vld [vmem:[#allocation8 + $0x10c] sm:$0xf]  ;;  %v3372_v49 = vld [vmem:[#allocation8 + $0x118] sm:$0xf0] }
 0x138   :  { %2251 = vmatpush.bf16.msrb.mxu2 %v4059_v50  ;;  %v4187_v50 = vor.u32 %v4863_v43, %v4186_v41  ;;  %v4171_v63 = vor.u32 %v4859_v55, %v4170_v54  ;;  %v3743_v41 = vor.u32 %v4749_v26, %v3740_v28 }
 0x139   :  { %2261 = vmatpush.bf16.msra.mxu3 %v4235_v1  ;;  %v3583_v1 = vor.u32 %v4709_v59, %v3580_v60  ;;  %v3260_v59 = vld [vmem:[#allocation8 + $0x38] sm:$0xf0]  ;;  %v4693_v60 = vld [vmem:[#allocation8 + $0x22c] sm:$0xf] }
 0x13a   :  { %2226 = vmatpush.bf16.msra.mxu0 %v3787_v61  ;;  %v4669_v61 = vld [vmem:[#allocation8 + $0x16c] sm:$0xf] }
 0x13b   :  { %2241 = vmatpush.bf16.msrb.mxu1 %v3883_v5  ;;  %v5411_v51 = vpop.f32.mrf.mxu1  ;;  %v3423_v6 = vor.u32 %v4669_v61, %v3420_v62  ;;  %v3516_v61 = vld [vmem:[#allocation8 + $0x238] sm:$0xf0] }
 0x13c   :  { %2252 = vmatpush.bf16.msrb.mxu2 %v4043_v0  ;;  %v3327_v0 = vor.u32 %v4645_v56, %v3324_v58  ;;  %v4629_v56 = vld [vmem:[#allocation8 + $0x2c] sm:$0xf]  ;;  %v3375_v58 = vor.u32 %v4657_v48, %v3372_v49 }
 0x13d   :  { %2262 = vmatpush.bf16.msra.mxu3 %v4219_v17  ;;  %v3311_v17 = vor.u32 %v4641_v4, %v3308_v7  ;;  %v3263_v4 = vor.u32 %v4629_v56, %v3260_v59  ;;  %v4625_v7 = vld [vmem:[#allocation8 + $0xc] sm:$0xf]  ;;  %v4092_v59 = vld [vmem:[#allocation8 + $0x6b8] sm:$0xf0] }
 0x13e   :  { %2227 = vmatpush.bf16.msra.mxu0 %v3771_v11  ;;  %2242 = vmatmul.bf16.vlgmr.msrb.gmra.mxu1 %v5382_v10  ;;  %v4665_v11 = vld [vmem:[#allocation8 + $0x14c] sm:$0xf] }
 0x13f   :  { %2286 = vmatpush.bf16.msra.mxu1 %v3487_v9  ;;  %v3564_v9 = vld [vmem:[#allocation8 + $0x298] sm:$0xf0]  ;;  %v3407_v22 = vor.u32 %v4665_v11, %v3404_v12  ;;  %v4729_v49 = vld [vmem:[#allocation8 + $0x34c] sm:$0xf] }
 0x140   :  { %2253 = vmatpush.bf16.msrb.mxu2 %v4027_v16  ;;  %v3567_v18 = vor.u32 %v4705_v8, %v3564_v9  ;;  %v3244_v8 = vld [vmem:[#allocation8 + $0x18] sm:$0xf0]  ;;  %v4689_v9 = vld [vmem:[#allocation8 + $0x20c] sm:$0xf] }
 0x141   :  { %2263 = vmatpush.bf16.msra.mxu3 %v4203_v35  ;;  %v5415_v5 = vpop.f32.mrf.mxu0  ;;  %v3500_v12 = vld [vmem:[#allocation8 + $0x218] sm:$0xf0]  ;;  %v3247_v26 = vor.u32 %v4625_v7, %v3244_v8  ;;  %v4773_v56 = vld [vmem:[#allocation8 + $0x4ac] sm:$0xf] }
 0x142   :  { %2228 = vmatpush.bf16.msra.mxu0 %v3755_v25  ;;  %v3388_v25 = vld [vmem:[#allocation8 + $0x138] sm:$0xf0]  ;;  %v3503_v28 = vor.u32 %v4689_v9, %v3500_v12  ;;  %v4793_v9 = vld [vmem:[#allocation8 + $0x54c] sm:$0xf] }
 0x143   :  { %2287 = vmatpush.bf16.msra.mxu1 %v3471_v24  ;;  %v1985_v16 = vpop.f32.mrf.mxu1  ;;  %v3548_v24 = vld [vmem:[#allocation8 + $0x278] sm:$0xf0]  ;;  %v3391_v42 = vor.u32 %v4661_v29, %v3388_v25 }
 0x144   :  { %2254 = vmatpush.bf16.msrb.mxu2 %v4011_v34  ;;  %v3295_v34 = vor.u32 %v4637_v20, %v3292_v21  ;;  %v3551_v35 = vor.u32 %v4701_v23, %v3548_v24  ;;  %v4845_v20 = vld [vmem:[#allocation8 + $0x6ec] sm:$0xf]  ;;  %v4124_v21 = vld [vmem:[#allocation8 + $0x6f8] sm:$0xf0] }
 0x145   :  { %2229 = vmatmul.bf16.vlgmr.msra.gmra.mxu0 %v5385_v27  ;;  %2264 = vmatpush.bf16.msra.mxu3 %v4187_v50  ;;  %v4813_v50 = vld [vmem:[#allocation8 + $0x5ec] sm:$0xf]  ;;  %v3964_v23 = vld [vmem:[#allocation8 + $0x5b8] sm:$0xf0] }
 0x146   :  { %2273 = vmatpush.bf16.msrb.mxu0 %v3359_v37  ;;  %v4633_v37 = vld [vmem:[#allocation8 + $0x4c] sm:$0xf]  ;;  %v3820_v7 = vld [vmem:[#allocation8 + $0x498] sm:$0xf0] }
 0x147   :  { %2288 = vmatpush.bf16.msra.mxu1 %v3455_v44  ;;  %2255 = vmatmul.bf16.vlgmr.msrb.gmra.mxu2 %v5390_v36  ;;  %v4697_v44 = vld [vmem:[#allocation8 + $0x24c] sm:$0xf] }
 0x148   :  { %2299 = vmatpush.bf16.msra.mxu2 %v3615_v40  ;;  %v3276_v40 = vld [vmem:[#allocation8 + $0x58] sm:$0xf0]  ;;  %v3535_v55 = vor.u32 %v4697_v44, %v3532_v45  ;;  %v4801_v45 = vld [vmem:[#allocation8 + $0x58c] sm:$0xf] }
 0x149   :  { %2265 = vmatpush.bf16.msra.mxu3 %v4171_v63  ;;  %v1972_v43 = vpop.f32.mrf.mxu0  ;;  %v3279_v54 = vor.u32 %v4633_v37, %v3276_v40  ;;  %v4741_v63 = vld [vmem:[#allocation8 + $0x3ac] sm:$0xf]  ;;  %v4108_v44 = vld [vmem:[#allocation8 + $0x6d8] sm:$0xf0] }
 0x14a   :  { %2274 = vmatpush.bf16.msrb.mxu0 %v3343_v52  ;;  %v5417_v33 = vpop.f32.mrf.mxu2  ;;  %v3996_v52 = vld [vmem:[#allocation8 + $0x5f8] sm:$0xf0]  ;;  %v4777_v40 = vld [vmem:[#allocation8 + $0x4cc] sm:$0xf] }
 0x14b   :  { %2289 = vmatpush.bf16.msra.mxu1 %v3439_v57  ;;  %v3727_v57 = vor.u32 %v4745_v46, %v3724_v47  ;;  %v3999_v62 = vor.u32 %v4813_v50, %v3996_v52  ;;  %v4841_v43 = vld [vmem:[#allocation8 + $0x6cc] sm:$0xf]  ;;  %v3948_v46 = vld [vmem:[#allocation8 + $0x598] sm:$0xf0] }
 0x14c   :  { %2300 = vmatpush.bf16.msra.mxu2 %v3599_v53  ;;  %v5419_v53 = vpop.f32.mrf.mxu1  ;;  %v3660_v50 = vld [vmem:[#allocation8 + $0x358] sm:$0xf0] }
 0x14d   :  { %2266 = vmatpush.bf16.msra.mxu3 %v4155_v14  ;;  %v4737_v14 = vld [vmem:[#allocation8 + $0x38c] sm:$0xf] }
 0x14e   :  { %2275 = vmatpush.bf16.msrb.mxu0 %v3327_v0  ;;  %v3708_v0 = vld [vmem:[#allocation8 + $0x3b8] sm:$0xf0]  ;;  %v3695_v29 = vor.u32 %v4737_v14, %v3692_v15  ;;  %v5433_v14 = vld [vmem:[#allocation10] sm:$0xf] }
 0x14f   :  { %2290 = vmatpush.bf16.msra.mxu1 %v3423_v6  ;;  %v3519_v6 = vor.u32 %v4693_v60, %v3516_v61  ;;  %v3711_v11 = vor.u32 %v4741_v63, %v3708_v0  ;;  %v4797_v60 = vld [vmem:[#allocation8 + $0x56c] sm:$0xf]  ;;  %v3932_v61 = vld [vmem:[#allocation8 + $0x578] sm:$0xf0]  ;;  %v3663_v63 = vor.u32 %v4729_v49, %v3660_v50 }
 0x150   :  { %2301 = vmatpush.bf16.msra.mxu2 %v3583_v1  ;;  %v4809_v1 = vld [vmem:[#allocation8 + $0x5cc] sm:$0xf]  ;;  %v4044_v50 = vld [vmem:[#allocation8 + $0x658] sm:$0xf0] }
 0x151   :  { %2267 = vmatpush.bf16.msra.mxu3 %v4139_v30  ;;  %v4733_v30 = vld [vmem:[#allocation8 + $0x36c] sm:$0xf] }
 0x152   :  { %2276 = vmatpush.bf16.msrb.mxu0 %v3311_v17  ;;  %v1998_v3 = vpop.f32.mrf.mxu2  ;;  %v5422_v16 = vpop.f32.mrf.mxu0  ;;  %v3983_v17 = vor.u32 %v4809_v1, %v3980_v2  ;;  %v4725_v1 = vld [vmem:[#allocation8 + $0x32c] sm:$0xf]  ;;  %v3644_v2 = vld [vmem:[#allocation8 + $0x338] sm:$0xf0] }
 0x153   :  { %2291 = vmatpush.bf16.msra.mxu1 %v3407_v22  ;;  %v4805_v22 = vld [vmem:[#allocation8 + $0x5ac] sm:$0xf]  ;;  %v3647_v15 = vor.u32 %v4725_v1, %v3644_v2 }
 0x154   :  { %2302 = vmatpush.bf16.msra.mxu2 %v3567_v18  ;;  %2268 = vmatmul.bf16.vlgmr.msra.gmra.mxu3 %v5396_v39  ;;  %v4781_v18 = vld [vmem:[#allocation8 + $0x4ec] sm:$0xf]  ;;  %v2037_v24 = vpop.f32.mrf.mxu1  ;;  %v3967_v37 = vor.u32 %v4805_v22, %v3964_v23 }
 0x155   :  { %2312 = vmatpush.bf16.msrb.mxu3 %v3743_v41  ;;  %v3871_v25 = vor.u32 %v4781_v18, %v3868_v19  ;;  %v3852_v41 = vld [vmem:[#allocation8 + $0x4d8] sm:$0xf0]  ;;  %v4721_v18 = vld [vmem:[#allocation8 + $0x30c] sm:$0xf] }
 0x156   :  { %2277 = vmatpush.bf16.msrb.mxu0 %v3295_v34  ;;  %v3676_v34 = vld [vmem:[#allocation8 + $0x378] sm:$0xf0]  ;;  %v3855_v48 = vor.u32 %v4777_v40, %v3852_v41  ;;  %v4765_v23 = vld [vmem:[#allocation8 + $0x46c] sm:$0xf] }
 0x157   :  { %2292 = vmatpush.bf16.msra.mxu1 %v3391_v42  ;;  %v5425_v42 = vpop.f32.mrf.mxu3  ;;  %v3628_v19 = vld [vmem:[#allocation8 + $0x318] sm:$0xf0]  ;;  %v4757_v2 = vld [vmem:[#allocation8 + $0x42c] sm:$0xf] }
 0x158   :  { %2303 = vmatpush.bf16.msra.mxu2 %v3551_v35  ;;  %v4127_v35 = vor.u32 %v4845_v20, %v4124_v21  ;;  %v3804_v24 = vld [vmem:[#allocation8 + $0x478] sm:$0xf0]  ;;  %v3631_v40 = vor.u32 %v4721_v18, %v3628_v19  ;;  %v4753_v18 = vld [vmem:[#allocation8 + $0x40c] sm:$0xf] }
 0x159   :  { %2313 = vmatpush.bf16.msrb.mxu3 %v3727_v57  ;;  %v3836_v57 = vld [vmem:[#allocation8 + $0x4b8] sm:$0xf0]  ;;  %v3807_v41 = vor.u32 %v4765_v23, %v3804_v24 }
 0x15a   :  { %2278 = vmatpush.bf16.msrb.mxu0 %v3279_v54  ;;  %v5427_v47 = vpop.f32.mrf.mxu2  ;;  %v2024_v52 = vpop.f32.mrf.mxu0  ;;  %v4111_v54 = vor.u32 %v4841_v43, %v4108_v44  ;;  %v3839_v0 = vor.u32 %v4773_v56, %v3836_v57  ;;  %v3884_v56 = vld [vmem:[#allocation8 + $0x518] sm:$0xf0] }
 0x15b   :  { %2293 = vmatpush.bf16.msra.mxu1 %v3375_v58  ;;  %v4837_v58 = vld [vmem:[#allocation8 + $0x6ac] sm:$0xf]  ;;  %v3756_v19 = vld [vmem:[#allocation8 + $0x418] sm:$0xf0] }
 0x15c   :  { %2304 = vmatpush.bf16.msra.mxu2 %v3535_v55  ;;  %v3951_v55 = vor.u32 %v4801_v45, %v3948_v46  ;;  %v4095_v3 = vor.u32 %v4837_v58, %v4092_v59  ;;  %v4761_v45 = vld [vmem:[#allocation8 + $0x44c] sm:$0xf]  ;;  %v3788_v46 = vld [vmem:[#allocation8 + $0x458] sm:$0xf0] }
 0x15d   :  { %2314 = vmatpush.bf16.msrb.mxu3 %v3711_v11  ;;  %v3916_v11 = vld [vmem:[#allocation8 + $0x558] sm:$0xf0]  ;;  %v4873_v52 = vld [vmem:[#allocation8 + $0x7cc] sm:$0xf]  ;;  %v3791_v59 = vor.u32 %v4761_v45, %v3788_v46  ;;  %v4306_v45 = vld [vmem:[#allocation11 + $0x60] sm:$0xf] }
 0x15e   :  { %2279 = vmatpush.bf16.msrb.mxu0 %v3263_v4  ;;  %2294 = vmatmul.bf16.vlgmr.msra.gmra.mxu1 %v5371_v13  ;;  %v3679_v13 = vor.u32 %v4733_v30, %v3676_v34  ;;  %v3935_v4 = vor.u32 %v4797_v60, %v3932_v61  ;;  %v3919_v22 = vor.u32 %v4793_v9, %v3916_v11  ;;  %v4789_v34 = vld [vmem:[#allocation8 + $0x52c] sm:$0xf]  ;;  %v4378_v60 = vld [vmem:[#allocation11 + $0xf0] sm:$0xf]  ;;  %v4911_v61 = vld [vmem:[#allocation11 + $0xf4] sm:$0xf0] }
 0x15f   :  { %2338 = vmatpush.bf16.msrb.mxu1 %v3999_v62  ;;  %v5431_v62 = vpop.f32.mrf.mxu1  ;;  %v2011_v8 = vpop.f32.mrf.mxu3  ;;  %v4370_v11 = vld [vmem:[#allocation11 + $0xe0] sm:$0xf]  ;;  %v4012_v24 = vld [vmem:[#allocation8 + $0x618] sm:$0xf0]  ;;  %v4893_v46 = vld [vmem:[#allocation11 + $0x64] sm:$0xf0] }
 0x160   :  { %2305 = vmatpush.bf16.msra.mxu2 %v3519_v6  ;;  %v4769_v6 = vld [vmem:[#allocation8 + $0x48c] sm:$0xf]  ;;  %v4379_v8 = vor.u32 %v4911_v61, %v4378_v60  ;;  %v4346_v61 = vld [vmem:[#allocation11 + $0xb0] sm:$0xf] }
 0x161   :  { %2315 = vmatpush.bf16.msrb.mxu3 %v3695_v29  ;;  %v4877_v29 = vld [vmem:[#allocation8 + $0x7ec] sm:$0xf] }
 0x162   :  { %2280 = vmatpush.bf16.msrb.mxu0 %v3247_v26  ;;  %v2050_v12 = vpop.f32.mrf.mxu2  ;;  %v5435_v20 = vpop.f32.mrf.mxu0  ;;  %v4829_v26 = vld [vmem:[#allocation8 + $0x66c] sm:$0xf] }
 0x163   :  { %2339 = vmatpush.bf16.msrb.mxu1 %v3983_v17  ;;  %v3823_v17 = vor.u32 %v4769_v6, %v3820_v7  ;;  %v4028_v7 = vld [vmem:[#allocation8 + $0x638] sm:$0xf0]  ;;  %v4909_v12 = vld [vmem:[#allocation11 + $0xe4] sm:$0xf0] }
 0x164   :  { %2306 = vmatpush.bf16.msra.mxu2 %v3503_v28  ;;  %v4060_v28 = vld [vmem:[#allocation8 + $0x678] sm:$0xf0] }
 0x165   :  { %2281 = vmatmul.bf16.vlgmr.msrb.gmra.mxu0 %v5375_v32  ;;  %2316 = vmatpush.bf16.msrb.mxu3 %v3679_v13  ;;  %v4833_v32 = vld [vmem:[#allocation8 + $0x68c] sm:$0xf]  ;;  %v4063_v43 = vor.u32 %v4829_v26, %v4060_v28  ;;  %v4204_v26 = vld [vmem:[#allocation8 + $0x798] sm:$0xf0]  ;;  %v4314_v28 = vld [vmem:[#allocation11 + $0x70] sm:$0xf] }
 0x166   :  { %2325 = vmatpush.bf16.msra.mxu0 %v3871_v25  ;;  %v4252_v25 = vld [vmem:[#allocation8 + $0x7f8] sm:$0xf0]  ;;  %v4825_v13 = vld [vmem:[#allocation8 + $0x64c] sm:$0xf] }
 0x167   :  { %2340 = vmatpush.bf16.msrb.mxu1 %v3967_v37  ;;  %2307 = vmatmul.bf16.vlgmr.msra.gmra.mxu2 %v5378_v38  ;;  %v4076_v38 = vld [vmem:[#allocation8 + $0x698] sm:$0xf0]  ;;  %v2089_v30 = vpop.f32.mrf.mxu1  ;;  %v673_v37 = vperm.slane %v5433_v14, 0  ;;  %v4255_v44 = vor.u32 %v4877_v29, %v4252_v25  ;;  %v4371_v29 = vor.u32 %v4909_v12, %v4370_v11  ;;  %v4849_v11 = vld [vmem:[#allocation8 + $0x70c] sm:$0xf] }
 0x168   :  { %2351 = vmatpush.bf16.msrb.mxu2 %v4127_v35  ;;  %v4079_v21 = vor.u32 %v4833_v32, %v4076_v38  ;;  %v3900_v35 = vld [vmem:[#allocation8 + $0x538] sm:$0xf0]  ;;  %v4869_v32 = vld [vmem:[#allocation8 + $0x7ac] sm:$0xf] }
 0x169   :  { %2317 = vmatpush.bf16.msrb.mxu3 %v3663_v63  ;;  %v3903_v49 = vor.u32 %v4789_v34, %v3900_v35  ;;  %v1971_v57 = vadd.f32 %v5415_v5, %v673_v37  ;;  %v4220_v5 = vld [vmem:[#allocation8 + $0x7b8] sm:$0xf0]  ;;  %v3759_v34 = vor.u32 %v4753_v18, %v3756_v19  ;;  %v4362_v35 = vld [vmem:[#allocation11 + $0xd0] sm:$0xf]  ;;  %v674_v19 = vperm.slane %v5433_v14, 1 }
 0x16a   :  { %2326 = vmatpush.bf16.msra.mxu0 %v3855_v48  ;;  %v5438_v48 = vpop.f32.mrf.mxu3  ;;  %v5441_v58 = vpop.f32.mrf.mxu2  ;;  %v4907_v37 = vld [vmem:[#allocation11 + $0xd4] sm:$0xf0] }
 0x16b   :  { %2341 = vmatpush.bf16.msrb.mxu1 %v3951_v55  ;;  %v4785_v55 = vld [vmem:[#allocation8 + $0x50c] sm:$0xf]  ;;  %v2076_v63 = vpop.f32.mrf.mxu0  ;;  %v1984_v38 = vadd.f32 %v5411_v51, %v1971_v57  ;;  %v4895_v51 = vld [vmem:[#allocation11 + $0x74] sm:$0xf0] }
 0x16c   :  { %2352 = vmatpush.bf16.msrb.mxu2 %v4111_v54  ;;  %v4236_v54 = vld [vmem:[#allocation8 + $0x7d8] sm:$0xf0]  ;;  %v3887_v6 = vor.u32 %v4785_v55, %v3884_v56  ;;  %v4857_v55 = vld [vmem:[#allocation8 + $0x74c] sm:$0xf] }
 0x16d   :  { %2318 = vmatpush.bf16.msrb.mxu3 %v3647_v15  ;;  %v4239_v1 = vor.u32 %v4873_v52, %v4236_v54  ;;  %v4307_v54 = vor.u32 %v4893_v46, %v4306_v45  ;;  %v4172_v56 = vld [vmem:[#allocation8 + $0x758] sm:$0xf0] }
 0x16e   :  { %2327 = vmatpush.bf16.msra.mxu0 %v3839_v0  ;;  %v4047_v0 = vor.u32 %v4825_v13, %v4044_v50  ;;  %v4363_v13 = vor.u32 %v4907_v37, %v4362_v35  ;;  %v4905_v50 = vld [vmem:[#allocation11 + $0xc4] sm:$0xf0]  ;;  %v4891_v57 = vld [vmem:[#allocation11 + $0x54] sm:$0xf0]  ;;  %v4910_v35 = vld [vmem:[#allocation11 + $0xf4] sm:$0xf] }
 0x16f   :  { %2342 = vmatpush.bf16.msrb.mxu1 %v3935_v4  ;;  %v4821_v4 = vld [vmem:[#allocation8 + $0x62c] sm:$0xf]  ;;  %v4903_v63 = vld [vmem:[#allocation11 + $0xb4] sm:$0xf0]  ;;  %v4380_v37 = vld [vmem:[#allocation11 + $0xf8] sm:$0xf0] }
 0x170   :  { %2353 = vmatpush.bf16.msrb.mxu2 %v4095_v3  ;;  %v3772_v3 = vld [vmem:[#allocation8 + $0x438] sm:$0xf0]  ;;  %v4031_v15 = vor.u32 %v4821_v4, %v4028_v7  ;;  %v4290_v4 = vld [vmem:[#allocation11 + $0x40] sm:$0xf]  ;;  %v4347_v7 = vor.u32 %v4903_v63, %v4346_v61 }
 0x171   :  { %2319 = vmatpush.bf16.msrb.mxu3 %v3631_v40  ;;  %v3775_v9 = vor.u32 %v4757_v2, %v3772_v3  ;;  %v4853_v3 = vld [vmem:[#allocation8 + $0x72c] sm:$0xf]  ;;  %v4140_v12 = vld [vmem:[#allocation8 + $0x718] sm:$0xf0] }
 0x172   :  { %2328 = vmatpush.bf16.msra.mxu0 %v3823_v17  ;;  %v4223_v17 = vor.u32 %v4869_v32, %v4220_v5  ;;  %v2063_v23 = vpop.f32.mrf.mxu3  ;;  %v2102_v30 = vpop.f32.mrf.mxu2  ;;  %v4338_v32 = vld [vmem:[#allocation11 + $0xa0] sm:$0xf] }
 0x173   :  { %2343 = vmatpush.bf16.msrb.mxu1 %v3919_v22  ;;  %v1997_v22 = vadd.f32 %v5417_v33, %v1984_v38  ;;  %v4897_v30 = vld [vmem:[#allocation11 + $0x84] sm:$0xf0] }
 0x174   :  { %2354 = vmatpush.bf16.msrb.mxu2 %v4079_v21  ;;  %2320 = vmatmul.bf16.vlgmr.msrb.gmra.mxu3 %v5388_v31  ;;  %v4817_v21 = vld [vmem:[#allocation8 + $0x60c] sm:$0xf] }
 0x175   :  { %2364 = vmatpush.bf16.msra.mxu3 %v4255_v44  ;;  %v4865_v31 = vld [vmem:[#allocation8 + $0x78c] sm:$0xf]  ;;  %v2010_v25 = vadd.f32 %v5425_v42, %v1997_v22  ;;  %v4015_v40 = vor.u32 %v4817_v21, %v4012_v24  ;;  %v4188_v44 = vld [vmem:[#allocation8 + $0x778] sm:$0xf0]  ;;  %v4330_v22 = vld [vmem:[#allocation11 + $0x90] sm:$0xf]  ;;  %v4143_v24 = vor.u32 %v4849_v11, %v4140_v12 }
 0x176   :  { %2329 = vmatpush.bf16.msra.mxu0 %v3807_v41  ;;  %v4207_v33 = vor.u32 %v4865_v31, %v4204_v26  ;;  %v4315_v41 = vor.u32 %v4895_v51, %v4314_v28  ;;  %v4274_v26 = vld [vmem:[#allocation11 + $0x20] sm:$0xf]  ;;  %v4885_v28 = vld [vmem:[#allocation11 + $0x24] sm:$0xf0]  ;;  %v4902_v11 = vld [vmem:[#allocation11 + $0xb4] sm:$0xf] }
 0x177   :  { %2344 = vmatpush.bf16.msrb.mxu1 %v3903_v49  ;;  %v2023_v42 = vadd.f32 %v5422_v16, %v2010_v25  ;;  %v4354_v49 = vld [vmem:[#allocation11 + $0xc0] sm:$0xf] }
 0x178   :  { %2355 = vmatpush.bf16.msrb.mxu2 %v4063_v43  ;;  %v4861_v43 = vld [vmem:[#allocation8 + $0x76c] sm:$0xf]  ;;  %v4322_v25 = vld [vmem:[#allocation11 + $0x80] sm:$0xf] }
 0x179   :  { %2365 = vmatpush.bf16.msra.mxu3 %v4239_v1  ;;  %v4191_v52 = vor.u32 %v4861_v43, %v4188_v44  ;;  %v2036_v60 = vadd.f32 %v5419_v53, %v2023_v42  ;;  %v4175_v1 = vor.u32 %v4857_v55, %v4172_v56  ;;  %v4266_v43 = vld [vmem:[#allocation11 + $0x10] sm:$0xf]  ;;  %v4883_v44 = vld [vmem:[#allocation11 + $0x14] sm:$0xf0]  ;;  %v4323_v45 = vor.u32 %v4897_v30, %v4322_v25  ;;  %v4372_v42 = vld [vmem:[#allocation11 + $0xe8] sm:$0xf0] }
 0x17a   :  { %2330 = vmatpush.bf16.msra.mxu0 %v3791_v59  ;;  %v4355_v59 = vor.u32 %v4905_v50, %v4354_v49  ;;  %v5452_v16 = vpop.f32.mrf.mxu3  ;;  %v4267_v50 = vor.u32 %v4883_v44, %v4266_v43  ;;  %v4894_v56 = vld [vmem:[#allocation11 + $0x74] sm:$0xf]  ;;  %v4332_v43 = vld [vmem:[#allocation11 + $0x98] sm:$0xf0] }
 0x17b   :  { %2345 = vmatpush.bf16.msrb.mxu1 %v3887_v6  ;;  %v4889_v6 = vld [vmem:[#allocation11 + $0x44] sm:$0xf0]  ;;  %v2049_v53 = vadd.f32 %v5427_v47, %v2036_v60  ;;  %v4899_v47 = vld [vmem:[#allocation11 + $0x94] sm:$0xf0] }
 0x17c   :  { %2356 = vmatpush.bf16.msrb.mxu2 %v4047_v0  ;;  %v5454_v0 = vpop.f32.mrf.mxu1  ;;  %v4331_v51 = vor.u32 %v4899_v47, %v4330_v22 }
 0x17d   :  { %2366 = vmatpush.bf16.msra.mxu3 %v4223_v17  ;;  %v4887_v17 = vld [vmem:[#allocation11 + $0x34] sm:$0xf0] }
 0x17e   :  { %2331 = vmatpush.bf16.msra.mxu0 %v3775_v9  ;;  %2346 = vmatmul.bf16.vlgmr.msrb.gmra.mxu1 %v5382_v10  ;;  %v4298_v10 = vld [vmem:[#allocation11 + $0x50] sm:$0xf]  ;;  %v4291_v9 = vor.u32 %v4889_v6, %v4290_v4  ;;  %v4356_v4 = vld [vmem:[#allocation11 + $0xc8] sm:$0xf0] }
 0x17f   :  { %2796 = vmatpush.bf16.msra.mxu1 %v4379_v8  ;;  %v4299_v2 = vor.u32 %v4891_v57, %v4298_v10  ;;  %v2062_v8 = vadd.f32 %v5438_v48, %v2049_v53  ;;  %v4316_v10 = vld [vmem:[#allocation11 + $0x78] sm:$0xf0]  ;;  %v4442_v6 = vld [vmem:[#allocation11 + $0x170] sm:$0xf] }
 0x180   :  { %2357 = vmatpush.bf16.msrb.mxu2 %v4031_v15  ;;  %v4282_v15 = vld [vmem:[#allocation11 + $0x30] sm:$0xf]  ;;  %v4319_v63 = vor.u32 %v4894_v56, %v4316_v10  ;;  %v4919_v56 = vld [vmem:[#allocation11 + $0x134] sm:$0xf0] }
 0x181   :  { %2367 = vmatpush.bf16.msra.mxu3 %v4207_v33  ;;  %v2377_v31 = vpack.c.bf16 %v2062_v8, %v2062_v8  ;;  %v4283_v48 = vor.u32 %v4887_v17, %v4282_v15  ;;  %v4890_v8 = vld [vmem:[#allocation11 + $0x54] sm:$0xf]  ;;  %v4348_v15 = vld [vmem:[#allocation11 + $0xb8] sm:$0xf0]  ;;  %v4925_v17 = vld [vmem:[#allocation11 + $0x164] sm:$0xf0] }
 0x182   :  { %2332 = vmatpush.bf16.msra.mxu0 %v3759_v34  ;;  %v2126_v38 = vpop.f32.mrf.mxu0  ;;  %v2115_v21 = vpop.f32.mrf.mxu3 }
 0x183   :  { %2797 = vmatpush.bf16.msra.mxu1 %v4371_v29  ;;  %v2075_v29 = vadd.f32 %v5435_v20, %v674_v19  ;;  %v4908_v20 = vld [vmem:[#allocation11 + $0xe4] sm:$0xf] }
 0x184   :  { %2358 = vmatpush.bf16.msrb.mxu2 %v4015_v40  ;;  %v2141_v23 = vpop.f32.mrf.mxu1  ;;  %v2381_v40 = vunpack.c.l.bf16 %v2377_v31  ;;  %v4375_v57 = vor.u32 %v4908_v20, %v4372_v42  ;;  %v4351_v31 = vor.u32 %v4902_v11, %v4348_v15  ;;  %v4884_v42 = vld [vmem:[#allocation11 + $0x24] sm:$0xf]  ;;  %v4926_v11 = vld [vmem:[#allocation11 + $0x174] sm:$0xf] }
 0x185   :  { %2333 = vmatmul.bf16.vlgmr.msra.gmra.mxu0 %v5385_v27  ;;  %2368 = vmatpush.bf16.msra.mxu3 %v4191_v52  ;;  %v4156_v27 = vld [vmem:[#allocation8 + $0x738] sm:$0xf0]  ;;  %v2088_v46 = vadd.f32 %v5431_v62, %v2075_v29  ;;  %v4258_v52 = vld [vmem:[#allocation11] sm:$0xf]  ;;  %v4888_v23 = vld [vmem:[#allocation11 + $0x44] sm:$0xf] }
 0x186   :  { %2783 = vmatpush.bf16.msrb.mxu0 %v4315_v41  ;;  %v4159_v5 = vor.u32 %v4853_v3, %v4156_v27  ;;  %v4275_v41 = vor.u32 %v4885_v28, %v4274_v26  ;;  %5003 = vtanh.f32 %v2381_v40  ;;  %v4904_v27 = vld [vmem:[#allocation11 + $0xc4] sm:$0xf]  ;;  %v4340_v26 = vld [vmem:[#allocation11 + $0xa8] sm:$0xf0]  ;;  %v4923_v29 = vld [vmem:[#allocation11 + $0x154] sm:$0xf0] }
 0x187   :  { %2798 = vmatpush.bf16.msra.mxu1 %v4363_v13  ;;  %2359 = vmatmul.bf16.vlgmr.msrb.gmra.mxu2 %v5390_v36  ;;  %v4901_v36 = vld [vmem:[#allocation11 + $0xa4] sm:$0xf0]  ;;  %v4383_v13 = vor.u32 %v4910_v35, %v4380_v37  ;;  %v2101_v49 = vadd.f32 %v5441_v58, %v2088_v46  ;;  %v4892_v58 = vld [vmem:[#allocation11 + $0x64] sm:$0xf]  ;;  %v4886_v35 = vld [vmem:[#allocation11 + $0x34] sm:$0xf] }
 0x188   :  { %v4339_v18 = vor.u32 %v4901_v36, %v4338_v32  ;;  %v4284_v37 = vld [vmem:[#allocation11 + $0x38] sm:$0xf0]  ;;  %v4921_v46 = vld [vmem:[#allocation11 + $0x144] sm:$0xf0] }
 0x189   :  { %2369 = vmatpush.bf16.msra.mxu3 %v4175_v1  ;;  %v2114_v55 = vadd.f32 %v5452_v16, %v2101_v49  ;;  %v4276_v49 = vld [vmem:[#allocation11 + $0x28] sm:$0xf0] }
 0x18a   :  { %2784 = vmatpush.bf16.msrb.mxu0 %v4307_v54  ;;  %v2152_v34 = vpop.f32.mrf.mxu2  ;;  %v2128_v33 = vpop.f32.mrf.mxu0  ;;  %v4881_v54 = vld [vmem:[#allocation11 + $0x4] sm:$0xf0] }
 0x18b   :  { %2799 = vmatpush.bf16.msra.mxu1 %v4355_v59  ;;  %v4906_v59 = vld [vmem:[#allocation11 + $0xd4] sm:$0xf]  ;;  %v2127_v60 = vadd.f32 %v2126_v38, %v2114_v55  ;;  %v4259_v61 = vor.u32 %v4881_v54, %v4258_v52  ;;  %v4300_v38 = vld [vmem:[#allocation11 + $0x58] sm:$0xf0]  ;;  %v4896_v52 = vld [vmem:[#allocation11 + $0x84] sm:$0xf] }
 0x18c   :  { %v5004_v1 = vpop.eup %5003  ;;  %v4303_v22 = vor.u32 %v4890_v8, %v4300_v38  ;;  %v4324_v54 = vld [vmem:[#allocation11 + $0x88] sm:$0xf0]  ;;  %v4410_v55 = vld [vmem:[#allocation11 + $0x130] sm:$0xf]  ;;  %v4386_v8 = vld [vmem:[#allocation11 + $0x100] sm:$0xf] }
 0x18d   :  { %2370 = vmatpush.bf16.msra.mxu3 %v4159_v5  ;;  %v2140_v16 = vadd.f32 %v5454_v0, %v2127_v60  ;;  %v5465_v53 = vpack.c.bf16 %v5004_v1, %v5004_v1  ;;  %v4434_v0 = vld [vmem:[#allocation11 + $0x160] sm:$0xf]  ;;  %v4327_v1 = vor.u32 %v4896_v52, %v4324_v54  ;;  %v4913_v38 = vld [vmem:[#allocation11 + $0x104] sm:$0xf0]  ;;  %v4912_v52 = vld [vmem:[#allocation11 + $0x104] sm:$0xf] }
 0x18e   :  { %2785 = vmatpush.bf16.msrb.mxu0 %v4299_v2  ;;  %v4308_v2 = vld [vmem:[#allocation11 + $0x68] sm:$0xf0]  ;;  %v4435_v21 = vor.u32 %v4925_v17, %v4434_v0  ;;  %v4924_v17 = vld [vmem:[#allocation11 + $0x164] sm:$0xf] }
 0x18f   :  { %2800 = vmatpush.bf16.msra.mxu1 %v4347_v7  ;;  %v4927_v7 = vld [vmem:[#allocation11 + $0x174] sm:$0xf0]  ;;  %v4311_v32 = vor.u32 %v4892_v58, %v4308_v2  ;;  %v2153_v5 = vadd.f32 %v2152_v34, %v2140_v16  ;;  %v4402_v58 = vld [vmem:[#allocation11 + $0x120] sm:$0xf]  ;;  %v4917_v2 = vld [vmem:[#allocation11 + $0x124] sm:$0xf0] }
 0x190   :  { %v4443_v36 = vor.u32 %v4927_v7, %v4442_v6  ;;  %v4260_v16 = vld [vmem:[#allocation11 + $0x8] sm:$0xf0]  ;;  %v4394_v6 = vld [vmem:[#allocation11 + $0x110] sm:$0xf]  ;;  %v4915_v7 = vld [vmem:[#allocation11 + $0x114] sm:$0xf0] }
 0x191   :  { %2371 = vmatpush.bf16.msra.mxu3 %v4143_v24  ;;  %v4292_v24 = vld [vmem:[#allocation11 + $0x48] sm:$0xf0] }
 0x192   :  { %2786 = vmatpush.bf16.msrb.mxu0 %v4291_v9  ;;  %v2154_v62 = vpop.f32.mrf.mxu2  ;;  %v4359_v9 = vor.u32 %v4904_v27, %v4356_v4  ;;  %2809 = vmatpush.bf16.msra.mxu2 %v4443_v36  ;;  %v4295_v25 = vor.u32 %v4888_v23, %v4292_v24  ;;  %v4880_v27 = vld [vmem:[#allocation11 + $0x4] sm:$0xf]  ;;  %v4403_v4 = vor.u32 %v4917_v2, %v4402_v58  ;;  %v4428_v23 = vld [vmem:[#allocation11 + $0x158] sm:$0xf0]  ;;  %v4388_v54 = vld [vmem:[#allocation11 + $0x108] sm:$0xf0] }
 0x193   :  { %2801 = vmatpush.bf16.msra.mxu1 %v4339_v18  ;;  %v4411_v62 = vor.u32 %v4919_v56, %v4410_v55  ;;  %v4391_v55 = vor.u32 %v4912_v52, %v4388_v54  ;;  %v4506_v56 = vld [vmem:[#allocation11 + $0x1f0] sm:$0xf] }
 0x194   :  { %2372 = vmatmul.bf16.vlgmr.msra.gmra.mxu3 %v5396_v39  ;;  %v4364_v39 = vld [vmem:[#allocation11 + $0xd8] sm:$0xf0]  ;;  %v4490_v2 = vld [vmem:[#allocation11 + $0x1d0] sm:$0xf] }
 0x195   :  { %v4367_v3 = vor.u32 %v4906_v59, %v4364_v39  ;;  %v4279_v39 = vor.u32 %v4884_v42, %v4276_v49 }
 0x196   :  { %2787 = vmatpush.bf16.msrb.mxu0 %v4283_v48  ;;  %v4900_v48 = vld [vmem:[#allocation11 + $0xa4] sm:$0xf]  ;;  %2810 = vmatpush.bf16.msra.mxu2 %v4435_v21 }
 0x197   :  { %2802 = vmatpush.bf16.msra.mxu1 %v4331_v51  ;;  %v2165_v12 = vpop.f32.mrf.mxu3  ;;  %v4426_v51 = vld [vmem:[#allocation11 + $0x150] sm:$0xf]  ;;  %v4343_v40 = vor.u32 %v4900_v48, %v4340_v26  ;;  %v675_v48 = vperm.slane %v5433_v14, 2 }
 0x198   :  { %v2166_v18 = vadd.f32 %v2165_v12, %v2153_v5  ;;  %v4427_v30 = vor.u32 %v4923_v29, %v4426_v51  ;;  %v4263_v5 = vor.u32 %v4880_v27, %v4260_v16  ;;  %v4444_v12 = vld [vmem:[#allocation11 + $0x178] sm:$0xf0]  ;;  %v4420_v51 = vld [vmem:[#allocation11 + $0x148] sm:$0xf0] }
 0x199   :  { %v4447_v15 = vor.u32 %v4926_v11, %v4444_v12 }
 0x19a   :  { %2788 = vmatpush.bf16.msrb.mxu0 %v4275_v41  ;;  %v2378_v47 = vpack.c.bf16 %v2166_v18, %v2166_v18  ;;  %v4898_v41 = vld [vmem:[#allocation11 + $0x94] sm:$0xf]  ;;  %2811 = vmatpush.bf16.msra.mxu2 %v4427_v30  ;;  %v4436_v18 = vld [vmem:[#allocation11 + $0x168] sm:$0xf0] }
 0x19b   :  { %2803 = vmatpush.bf16.msra.mxu1 %v4323_v45  ;;  %v5468_v19 = vpop.f32.mrf.mxu1  ;;  %v4418_v45 = vld [vmem:[#allocation11 + $0x140] sm:$0xf]  ;;  %v4918_v30 = vld [vmem:[#allocation11 + $0x134] sm:$0xf] }
 0x19c   :  { %v2382_v28 = vunpack.c.l.bf16 %v2378_v47  ;;  %v4419_v20 = vor.u32 %v4921_v46, %v4418_v45  ;;  %v4922_v47 = vld [vmem:[#allocation11 + $0x154] sm:$0xf] }
 0x19d   :  { %v4431_v24 = vor.u32 %v4922_v47, %v4428_v23  ;;  %v4931_v47 = vld [vmem:[#allocation11 + $0x194] sm:$0xf0] }
 0x19e   :  { %2789 = vmatpush.bf16.msrb.mxu0 %v4267_v50  ;;  %5005 = vtanh.f32 %v2382_v28  ;;  %v4335_v50 = vor.u32 %v4898_v41, %v4332_v43  ;;  %2812 = vmatpush.bf16.msra.mxu2 %v4419_v20  ;;  %v4920_v28 = vld [vmem:[#allocation11 + $0x144] sm:$0xf]  ;;  %v4396_v20 = vld [vmem:[#allocation11 + $0x118] sm:$0xf0] }
 0x19f   :  { %2848 = vmatpush.bf16.msrb.mxu1 %v4383_v13  ;;  %v2167_v33 = vpop.f32.mrf.mxu3  ;;  %v4287_v13 = vor.u32 %v4886_v35, %v4284_v37  ;;  %v4412_v35 = vld [vmem:[#allocation11 + $0x138] sm:$0xf0]  ;;  %v4916_v43 = vld [vmem:[#allocation11 + $0x124] sm:$0xf] }
 0x1a2   :  { %2790 = vmatpush.bf16.msrb.mxu0 %v4259_v61  ;;  %v5470_v34 = vpop.f32.mrf.mxu0  ;;  %v4882_v61 = vld [vmem:[#allocation11 + $0x14] sm:$0xf]  ;;  %2813 = vmatpush.bf16.msra.mxu2 %v4411_v62 }
 0x1a3   :  { %2849 = vmatpush.bf16.msrb.mxu1 %v4375_v57  ;;  %v2193_v44 = vpop.f32.mrf.mxu1 }
 0x1a4   :  { %v5006_v10 = vpop.eup %5005  ;;  %v4404_v44 = vld [vmem:[#allocation11 + $0x128] sm:$0xf0] }
 0x1a5   :  { %2791 = vmatmul.bf16.vlgmr.msrb.gmra.mxu0 %v5465_v53  ;;  %v2390_v59 = vpack.c.bf16 %v5006_v10, %v5006_v10  ;;  %v4407_v45 = vor.u32 %v4916_v43, %v4404_v44  ;;  %v4943_v10 = vld [vmem:[#allocation11 + $0x1f4] sm:$0xf0]  ;;  %v4936_v44 = vld [vmem:[#allocation11 + $0x1c4] sm:$0xf] }
 0x1a6   :  { %2835 = vmatpush.bf16.msra.mxu0 %v4319_v63  ;;  %v4268_v63 = vld [vmem:[#allocation11 + $0x18] sm:$0xf0]  ;;  %2814 = vmatpush.bf16.msra.mxu2 %v4403_v4 }
 0x1a7   :  { %2850 = vmatpush.bf16.msrb.mxu1 %v4367_v3  ;;  %v4271_v3 = vor.u32 %v4882_v61, %v4268_v63 }
 0x1a8   :  { %2804 = vmatmul.bf16.vlgmr.msra.gmra.mxu1 %v2390_v59 }
 0x1aa   :  { %2836 = vmatpush.bf16.msra.mxu0 %v4311_v32  ;;  %v5472_v57 = vpop.f32.mrf.mxu2  ;;  %v2180_v60 = vpop.f32.mrf.mxu0  ;;  %v4395_v32 = vor.u32 %v4915_v7, %v4394_v6  ;;  %v4482_v7 = vld [vmem:[#allocation11 + $0x1c0] sm:$0xf] }
 0x1ab   :  { %2851 = vmatpush.bf16.msrb.mxu1 %v4359_v9  ;;  %v4387_v9 = vor.u32 %v4913_v38, %v4386_v8  ;;  %v4941_v60 = vld [vmem:[#allocation11 + $0x1e4] sm:$0xf0]  ;;  %v4474_v8 = vld [vmem:[#allocation11 + $0x1b0] sm:$0xf]  ;;  %v4935_v38 = vld [vmem:[#allocation11 + $0x1b4] sm:$0xf0] }
 0x1ac   :  { %2815 = vmatpush.bf16.msra.mxu2 %v4395_v32  ;;  %v4937_v32 = vld [vmem:[#allocation11 + $0x1c4] sm:$0xf0]  ;;  %v4475_v12 = vor.u32 %v4935_v38, %v4474_v8  ;;  %v2457_v38 = vld [vmem:[%s5501_s6] sm:$0x3] }
 0x1ae   :  { %2837 = vmatpush.bf16.msra.mxu0 %v4303_v22  ;;  %v4439_v22 = vor.u32 %v4924_v17, %v4436_v18  ;;  %v4466_v17 = vld [vmem:[#allocation11 + $0x1a0] sm:$0xf]  ;;  %v4933_v18 = vld [vmem:[#allocation11 + $0x1a4] sm:$0xf0] }
 0x1af   :  { %2852 = vmatpush.bf16.msrb.mxu1 %v4351_v31 }
 0x1b0   :  { %2816 = vmatpush.bf16.msra.mxu2 %v4387_v9 }
 0x1b2   :  { %2838 = vmatpush.bf16.msra.mxu0 %v4295_v25  ;;  %v2206_v36 = vpop.f32.mrf.mxu2  ;;  %v2179_v25 = vadd.f32 %v5470_v34, %v675_v48  ;;  %v4929_v48 = vld [vmem:[#allocation11 + $0x184] sm:$0xf0] }
 0x1b3   :  { %2853 = vmatpush.bf16.msrb.mxu1 %v4343_v40  ;;  %v4415_v40 = vor.u32 %v4918_v30, %v4412_v35 }
 0x1b4   :  { %2861 = vmatpush.bf16.msrb.mxu2 %v4447_v15  ;;  %v2192_v41 = vadd.f32 %v5468_v19, %v2179_v25  ;;  %v4507_v19 = vor.u32 %v4943_v10, %v4506_v56  ;;  %v4500_v25 = vld [vmem:[#allocation11 + $0x1e8] sm:$0xf0] }
 0x1b5   :  { %v4468_v56 = vld [vmem:[#allocation11 + $0x1a8] sm:$0xf0] }
 0x1b6   :  { %2839 = vmatpush.bf16.msra.mxu0 %v4287_v13  ;;  %v2205_v46 = vadd.f32 %v5472_v57, %v2192_v41  ;;  %v4914_v13 = vld [vmem:[#allocation11 + $0x114] sm:$0xf]  ;;  %2822 = vmatpush.bf16.msrb.mxu3 %v4507_v19  ;;  %v4498_v57 = vld [vmem:[#allocation11 + $0x1e0] sm:$0xf] }
 0x1b7   :  { %2854 = vmatpush.bf16.msrb.mxu1 %v4335_v50  ;;  %v2217_v0 = vpop.f32.mrf.mxu3  ;;  %v4399_v42 = vor.u32 %v4914_v13, %v4396_v20 }
 0x1b8   :  { %2862 = vmatpush.bf16.msrb.mxu2 %v4439_v22  ;;  %v2218_v49 = vadd.f32 %v2217_v0, %v2205_v46  ;;  %v4458_v22 = vld [vmem:[#allocation11 + $0x190] sm:$0xf]  ;;  %v676_v46 = vperm.slane %v5433_v14, 3  ;;  %v4460_v14 = vld [vmem:[#allocation11 + $0x198] sm:$0xf0] }
 0x1b9   :  { %v4459_v23 = vor.u32 %v4931_v47, %v4458_v22 }
 0x1ba   :  { %2840 = vmatpush.bf16.msra.mxu0 %v4279_v39 }
 0x1bb   :  { %2855 = vmatpush.bf16.msrb.mxu1 %v4327_v1  ;;  %v2243_v21 = vpop.f32.mrf.mxu1  ;;  %v4499_v1 = vor.u32 %v4941_v60, %v4498_v57 }
 0x1bc   :  { %2863 = vmatpush.bf16.msrb.mxu2 %v4431_v24 }
 0x1bd   :  { %2823 = vmatpush.bf16.msrb.mxu3 %v4499_v1  ;;  %v4928_v1 = vld [vmem:[#allocation11 + $0x184] sm:$0xf] }
 0x1be   :  { %2841 = vmatpush.bf16.msra.mxu0 %v4271_v3  ;;  %2856 = vmatmul.bf16.vlgmr.msrb.gmra.mxu1 %v2390_v59  ;;  %v4939_v3 = vld [vmem:[#allocation11 + $0x1d4] sm:$0xf0] }
 0x1bf   :  { %v2219_v26 = vpop.f32.mrf.mxu3  ;;  %v4491_v4 = vor.u32 %v4939_v3, %v4490_v2 }
 0x1c1   :  { %2824 = vmatpush.bf16.msrb.mxu3 %v4491_v4 }
 0x1c2   :  { %2842 = vmatpush.bf16.msra.mxu0 %v4263_v5  ;;  %v2230_v31 = vpop.f32.mrf.mxu0  ;;  %v4483_v5 = vor.u32 %v4937_v32, %v4482_v7 }
 0x1c3   :  { %v2245_v29 = vpop.f32.mrf.mxu1  ;;  %v2231_v34 = vadd.f32 %v2230_v31, %v2218_v49  ;;  %v4450_v31 = vld [vmem:[#allocation11 + $0x180] sm:$0xf]  ;;  %v4934_v49 = vld [vmem:[#allocation11 + $0x1b4] sm:$0xf] }
 0x1c4   :  { %v4451_v26 = vor.u32 %v4929_v48, %v4450_v31  ;;  %v4951_v48 = vld [vmem:[#allocation13 + $0x38] sm:$0xff] }
 0x1c5   :  { %2843 = vmatmul.bf16.vlgmr.msra.gmra.mxu0 %v5465_v53  ;;  %v4423_v53 = vor.u32 %v4920_v28, %v4420_v51  ;;  %v2244_v62 = vadd.f32 %v2243_v21, %v2231_v34  ;;  %2825 = vmatpush.bf16.msrb.mxu3 %v4483_v5  ;;  %v4467_v21 = vor.u32 %v4933_v18, %v4466_v17  ;;  %v4942_v28 = vld [vmem:[#allocation11 + $0x1f4] sm:$0xf]  ;;  %v4508_v51 = vld [vmem:[#allocation11 + $0x1f8] sm:$0xf0]  ;;  %v2460_v18 = vperm.slane %v2457_v38, 1 }
 0x1c6   :  { %v4511_v29 = vor.u32 %v4942_v28, %v4508_v51  ;;  %3027 = vmatpush.bf16.msrb.mxu0 %v4951_v48  ;;  %v4949_v28 = vld [vmem:[#allocation13 + $0x28] sm:$0xff] }
 0x1c7   :  { %2864 = vmatpush.bf16.msrb.mxu2 %v4423_v53  ;;  %v4940_v53 = vld [vmem:[#allocation11 + $0x1e4] sm:$0xf] }
 0x1c8   :  { %v4503_v35 = vor.u32 %v4940_v53, %v4500_v25 }
 0x1c9   :  { %2826 = vmatpush.bf16.msrb.mxu3 %v4475_v12 }
 0x1ca   :  { %v2256_v37 = vpop.f32.mrf.mxu2  ;;  %v2232_v33 = vpop.f32.mrf.mxu0 }
 0x1cb   :  { %2865 = vmatpush.bf16.msrb.mxu2 %v4415_v40  ;;  %v2257_v59 = vadd.f32 %v2256_v37, %v2244_v62  ;;  %v4938_v40 = vld [vmem:[#allocation11 + $0x1d4] sm:$0xf]  ;;  %v4492_v33 = vld [vmem:[#allocation11 + $0x1d8] sm:$0xf0] }
 0x1cc   :  { %v4495_v41 = vor.u32 %v4938_v40, %v4492_v33  ;;  %v4946_v40 = vld [vmem:[#allocation13 + $0x10] sm:$0xff] }
 0x1cd   :  { %2827 = vmatpush.bf16.msrb.mxu3 %v4467_v21  ;;  %v4958_v33 = vld [vmem:[#allocation13 + $0x70] sm:$0xff] }
 0x1cf   :  { %2866 = vmatpush.bf16.msrb.mxu2 %v4407_v45  ;;  %v4484_v45 = vld [vmem:[#allocation11 + $0x1c8] sm:$0xf0] }
 0x1d0   :  { %v4487_v20 = vor.u32 %v4936_v44, %v4484_v45  ;;  %v4944_v44 = vld [vmem:[#allocation13] sm:$0xff] }
 0x1d1   :  { %2828 = vmatpush.bf16.msrb.mxu3 %v4459_v23  ;;  %v4956_v45 = vld [vmem:[#allocation13 + $0x60] sm:$0xff] }
 0x1d2   :  { %v2258_v50 = vpop.f32.mrf.mxu2 }
 0x1d3   :  { %2867 = vmatpush.bf16.msrb.mxu2 %v4399_v42  ;;  %v4476_v50 = vld [vmem:[#allocation11 + $0x1b8] sm:$0xf0] }
 0x1d4   :  { %v4479_v52 = vor.u32 %v4934_v49, %v4476_v50 }
 0x1d5   :  { %2829 = vmatpush.bf16.msrb.mxu3 %v4451_v26  ;;  %v4950_v26 = vld [vmem:[#allocation13 + $0x30] sm:$0xff] }
 0x1d6   :  { %3028 = vmatpush.bf16.msrb.mxu0 %v4950_v26 }
 0x1d7   :  { %2868 = vmatpush.bf16.msrb.mxu2 %v4391_v55  ;;  %v2269_v39 = vpop.f32.mrf.mxu3  ;;  %v4932_v55 = vld [vmem:[#allocation11 + $0x1a4] sm:$0xf] }
 0x1d8   :  { %v2270_v61 = vadd.f32 %v2269_v39, %v2257_v59  ;;  %v4471_v62 = vor.u32 %v4932_v55, %v4468_v56  ;;  %v4930_v39 = vld [vmem:[#allocation11 + $0x194] sm:$0xf] }
 0x1d9   :  { %2874 = vmatpush.bf16.msra.mxu3 %v4511_v29  ;;  %v4463_v60 = vor.u32 %v4930_v39, %v4460_v14  ;;  %v4948_v29 = vld [vmem:[#allocation13 + $0x20] sm:$0xff] }
 0x1da   :  { %v2379_v58 = vpack.c.bf16 %v2270_v61, %v2270_v61  ;;  %3029 = vmatpush.bf16.msrb.mxu0 %v4949_v28 }
 0x1db   :  { %v5479_v63 = vpop.f32.mrf.mxu1 }
 0x1dc   :  { %v2383_v27 = vunpack.c.l.bf16 %v2379_v58  ;;  %v4452_v58 = vld [vmem:[#allocation11 + $0x188] sm:$0xf0] }
 0x1dd   :  { %2875 = vmatpush.bf16.msra.mxu3 %v4503_v35  ;;  %v4455_v3 = vor.u32 %v4928_v1, %v4452_v58  ;;  %v4947_v35 = vld [vmem:[#allocation13 + $0x18] sm:$0xff]  ;;  %v4966_v58 = vld [vmem:[#allocation14 + $0x30] sm:$0xff] }
 0x1de   :  { %5007 = vtanh.f32 %v2383_v27  ;;  %3030 = vmatpush.bf16.msrb.mxu0 %v4948_v29  ;;  %v4967_v1 = vld [vmem:[#allocation14 + $0x38] sm:$0xff] }
 0x1df   :  { %v2271_v6 = vpop.f32.mrf.mxu3 }
 0x1e1   :  { %2876 = vmatpush.bf16.msra.mxu3 %v4495_v41  ;;  %v4945_v41 = vld [vmem:[#allocation13 + $0x8] sm:$0xff] }
 0x1e2   :  { %v2282_v16 = vpop.f32.mrf.mxu0  ;;  %3031 = vmatpush.bf16.msrb.mxu0 %v4947_v35 }
 0x1e3   :  { %v2297_v36 = vpop.f32.mrf.mxu1  ;;  %v2283_v34 = vadd.f32 %v2282_v16, %v676_v46  ;;  %v4955_v46 = vld [vmem:[#allocation13 + $0x58] sm:$0xff] }
 0x1e4   :  { %v5008_v9 = vpop.eup %5007 }
 0x1e5   :  { %v2391_v15 = vpack.c.bf16 %v5008_v9, %v5008_v9  ;;  %2877 = vmatpush.bf16.msra.mxu3 %v4487_v20  ;;  %v2296_v19 = vadd.f32 %v5479_v63, %v2283_v34  ;;  %v4953_v20 = vld [vmem:[#allocation13 + $0x48] sm:$0xff] }
 0x1e6   :  { %3032 = vmatpush.bf16.msrb.mxu0 %v4946_v40 }
 0x1e7   :  { %2817 = vmatmul.bf16.vlgmr.msra.gmra.mxu2 %v2391_v15 }
 0x1e8   :  { %3125 = vmatpush.bf16.msra.mxu2 %v4967_v1 }
 0x1e9   :  { %2878 = vmatpush.bf16.msra.mxu3 %v4479_v52 }
 0x1ea   :  { %v2308_v11 = vpop.f32.mrf.mxu2  ;;  %v2284_v0 = vpop.f32.mrf.mxu0  ;;  %3033 = vmatpush.bf16.msrb.mxu0 %v4945_v41 }
 0x1eb   :  { %v2309_v59 = vadd.f32 %v2308_v11, %v2296_v19  ;;  %v2459_v11 = vperm.slane %v2457_v38, 0 }
 0x1ec   :  { %3126 = vmatpush.bf16.msra.mxu2 %v4966_v58 }
 0x1ed   :  { %2879 = vmatpush.bf16.msra.mxu3 %v4471_v62 }
 0x1ee   :  { %3034 = vmatpush.bf16.msrb.mxu0 %v4944_v44 }
 0x1f1   :  { %2880 = vmatpush.bf16.msra.mxu3 %v4463_v60 }
 0x1f2   :  { %v2310_v24 = vpop.f32.mrf.mxu2 }
 0x1f5   :  { %2881 = vmatpush.bf16.msra.mxu3 %v4455_v3  ;;  %v4964_v3 = vld [vmem:[#allocation14 + $0x20] sm:$0xff] }
 0x1f7   :  { %v2321_v30 = vpop.f32.mrf.mxu3  ;;  %2869 = vmatmul.bf16.vlgmr.msrb.gmra.mxu2 %v2391_v15 }
 0x1f8   :  { %v2322_v57 = vadd.f32 %v2321_v30, %v2309_v59 }
 0x1fb   :  { %v2347_v37 = vpop.f32.mrf.mxu1 }
 0x1ff   :  { %v2323_v13 = vpop.f32.mrf.mxu3 }
 0x200   :  { %v4954_v13 = vld [vmem:[#allocation13 + $0x50] sm:$0xff] }
 0x202   :  { %v2334_v43 = vpop.f32.mrf.mxu0 }
 0x203   :  { %v2349_v42 = vpop.f32.mrf.mxu1  ;;  %v2335_v2 = vadd.f32 %v2334_v43, %v2322_v57  ;;  %v4957_v43 = vld [vmem:[#allocation13 + $0x68] sm:$0xff] }
 0x204   :  { %v4952_v42 = vld [vmem:[#allocation13 + $0x40] sm:$0xff] }
 0x205   :  { %v2348_v27 = vadd.f32 %v2347_v37, %v2335_v2  ;;  %v4959_v37 = vld [vmem:[#allocation13 + $0x78] sm:$0xff]  ;;  %v4965_v2 = vld [vmem:[#allocation14 + $0x28] sm:$0xff] }
 0x206   :  { %3040 = vmatpush.bf16.msra.mxu1 %v4959_v37  ;;  %3127 = vmatpush.bf16.msra.mxu2 %v4965_v2 }
 0x20a   :  { %v2360_v54 = vpop.f32.mrf.mxu2  ;;  %v2336_v10 = vpop.f32.mrf.mxu0  ;;  %3041 = vmatpush.bf16.msra.mxu1 %v4958_v33  ;;  %3128 = vmatpush.bf16.msra.mxu2 %v4964_v3 }
 0x20b   :  { %v2361_v4 = vadd.f32 %v2360_v54, %v2348_v27  ;;  %v4963_v27 = vld [vmem:[#allocation14 + $0x18] sm:$0xff] }
 0x20e   :  { %3042 = vmatpush.bf16.msra.mxu1 %v4957_v43  ;;  %3129 = vmatpush.bf16.msra.mxu2 %v4963_v27 }
 0x212   :  { %v2362_v61 = vpop.f32.mrf.mxu2  ;;  %3043 = vmatpush.bf16.msra.mxu1 %v4956_v45 }
 0x216   :  { %3044 = vmatpush.bf16.msra.mxu1 %v4955_v46 }
 0x217   :  { %v2373_v16 = vpop.f32.mrf.mxu3 }
 0x218   :  { %v2374_v6 = vadd.f32 %v2373_v16, %v2361_v4  ;;  %v4962_v4 = vld [vmem:[#allocation14 + $0x10] sm:$0xff]  ;;  %v4961_v16 = vld [vmem:[#allocation14 + $0x8] sm:$0xff] }
 0x219   :  { %3130 = vmatpush.bf16.msra.mxu2 %v4962_v4 }
 0x21a   :  { %v2380_v7 = vpack.c.bf16 %v2374_v6, %v2374_v6  ;;  %3045 = vmatpush.bf16.msra.mxu1 %v4954_v13  ;;  %v4960_v6 = vld [vmem:[#allocation14] sm:$0xff] }
 0x21c   :  { %v2384_v32 = vunpack.c.l.bf16 %v2380_v7 }
 0x21d   :  { %3131 = vmatpush.bf16.msra.mxu2 %v4961_v16 }
 0x21e   :  { %5009 = vtanh.f32 %v2384_v32  ;;  %3046 = vmatpush.bf16.msra.mxu1 %v4953_v20 }
 0x21f   :  { %v2375_v36 = vpop.f32.mrf.mxu3 }
 0x221   :  { %3132 = vmatpush.bf16.msra.mxu2 %v4960_v6 }
 0x222   :  { %v2792_v63 = vpop.f32.mrf.mxu0  ;;  %3047 = vmatpush.bf16.msra.mxu1 %v4952_v42 }
 0x223   :  { %v2793_v12 = vadd.f32 %v2792_v63, %v2459_v11  ;;  %v4985_v63 = vld [vmem:[%s5503_s8] ss:$0 sm:$0xff]  ;;  %s3146_s8 = sshll.u32 %s5506_s11, 4  ;;  %s3147_s8 = int_to_ptr.hbm [resolvable:$true] %s3146_s8 }
 0x224   :  { %v5010_v5 = vpop.eup %5009 }
 0x225   :  { %v2392_v8 = vpack.c.bf16 %v5010_v5, %v5010_v5  ;;  %v2805_v15 = vpop.f32.mrf.mxu1 }
 0x226   :  { %v2806_v0 = vadd.f32 %v2805_v15, %v2793_v12 }
 0x227   :  { %2830 = vmatmul.bf16.vlgmr.msrb.gmra.mxu3 %v2392_v8 }
 0x22a   :  { %v2794_v9 = vpop.f32.mrf.mxu0 }
 0x22d   :  { %v2807_v17 = vpop.f32.mrf.mxu1 }
 0x237   :  { %2882 = vmatmul.bf16.vlgmr.msra.gmra.mxu3 %v2392_v8 }
 0x23b   :  { %v2857_v47 = vpop.f32.mrf.mxu1 }
 0x242   :  { %v2844_v21 = vpop.f32.mrf.mxu0 }
 0x243   :  { %v2845_v22 = vadd.f32 %v2844_v21, %v2460_v18  ;;  %v2859_v31 = vpop.f32.mrf.mxu1 }
 0x245   :  { %v2858_v23 = vadd.f32 %v2857_v47, %v2845_v22 }
 0x24a   :  { %v2846_v24 = vpop.f32.mrf.mxu0 }
 0x26a   :  { %v2818_v51 = vpop.f32.mrf.mxu2 }
 0x26b   :  { %v2819_v49 = vadd.f32 %v2818_v51, %v2806_v0  ;;  %v4986_v0 = vld [vmem:[%s5505_s10] ss:$0 sm:$0xff] }
 0x272   :  { %v2820_v53 = vpop.f32.mrf.mxu2 }
 0x27a   :  { %v2870_v25 = vpop.f32.mrf.mxu2 }
 0x27b   :  { %v2871_v62 = vadd.f32 %v2870_v25, %v2858_v23 }
 0x282   :  { %v2872_v30 = vpop.f32.mrf.mxu2 }
 0x2aa   :  { %v2831_v50 = vpop.f32.mrf.mxu3 }
 0x2ab   :  { %v2832_v34 = vadd.f32 %v2831_v50, %v2819_v49 }
 0x2ad   :  { %v2887_v52 = vpack.c.bf16 %v2832_v34, %v2832_v34 }
 0x2af   :  { %v2889_v54 = vunpack.c.l.bf16 %v2887_v52 }
 0x2b1   :  { %5011 = vtanh.f32 %v2889_v54 }
 0x2b2   :  { %v2833_v55 = vpop.f32.mrf.mxu3 }
 0x2b7   :  { %v5012_v56 = vpop.eup %5011 }
 0x2b8   :  { %v2893_v10 = vpack.c.bf16 %v5012_v56, %v5012_v56 }
 0x2ba   :  { %v2883_v19 = vpop.f32.mrf.mxu3  ;;  %3035 = vmatmul.bf16.vlgmr.msrb.gmra.mxu0 %v2893_v10 }
 0x2bb   :  { %v2884_v59 = vadd.f32 %v2883_v19, %v2871_v62 }
 0x2bd   :  { %v2888_v39 = vpack.c.bf16 %v2884_v59, %v2884_v59 }
 0x2bf   :  { %v2890_v14 = vunpack.c.l.bf16 %v2888_v39 }
 0x2c1   :  { %5013 = vtanh.f32 %v2890_v14 }
 0x2c2   :  { %v2885_v57 = vpop.f32.mrf.mxu3 }
 0x2c7   :  { %v5014_v60 = vpop.eup %5013 }
 0x2c8   :  { %v2894_v61 = vpack.c.bf16 %v5014_v60, %v5014_v60 }
 0x2ca   :  { %3048 = vmatmul.bf16.vlgmr.msra.gmra.mxu1 %v2894_v61 }
 0x337   :  { %v3036_v7 = vpop.f32.mrf.mxu0 }
 0x338   :  { %v3037_v36 = vadd.f32 %v4985_v63, %v3036_v7 }
 0x33f   :  { %v3038_v32 = vpop.f32.mrf.mxu0 }
 0x347   :  { %v3049_v5 = vpop.f32.mrf.mxu1 }
 0x348   :  { %v3050_v8 = vadd.f32 %v3049_v5, %v3037_v36 }
 0x34a   :  { %v3053_v38 = vpack.c.bf16 %v3050_v8, %v3050_v8 }
 0x34c   :  { %v3054_v9 = vunpack.c.l.bf16 %v3053_v38 }
 0x34e   :  { %5015 = vtanh.f32 %v3054_v9 }
 0x34f   :  { %v3051_v11 = vpop.f32.mrf.mxu1 }
 0x354   :  { %v5016_v12 = vpop.eup %5015 }
 0x355   :  { %v3056_v15 = vpack.c.bf16 %v5016_v12, %v5016_v12 }
 0x357   :  { %3133 = vmatmul.bf16.vlgmr.msra.gmra.mxu2 %v3056_v15 }
 0x3da   :  { %v3134_v17 = vpop.f32.mrf.mxu2 }
 0x3db   :  { %v3135_v18 = vadd.f32 %v4986_v0, %v3134_v17 }
 0x3dd   :  { %3138 = vst [vmem:[#allocation16] sm:$0xff] %v3135_v18 }
 0x3de   :  { %3149 = dma.vmem_to_hbm [thread:$0]  %s3145_s23, 128, %s3147_s8, [#allocation4]  }
 0x3e2   :  { %v3136_v21 = vpop.f32.mrf.mxu2 }
 0x3e3   :  { %5243 = dma.done.wait [#allocation4], 128  }
 0x3e4   :  { %5244 = vsyncadd [#allocation4], 4294967168 }
 0x3e5   :  { %3154 = vsyncpa [#allocation3], 1 }
 0x3e6   :  { %3155 = vsyncpa [#allocation6], 1 }
 0x3e7   :  { %3156 = vsyncpa [#allocation9], 1 }
 0x3e8   :  { %3157 = vsyncpa [#allocation12], 1 }
 0x3e9   :  { %3158 = vsyncpa [#allocation15], 1 }
 0x3ea   :  { %3159 = vsyncpa [#allocation4], 1 }

</bundles_post_ra>
